<compile_context>
chip_gen: v6e
topology: v6e:2x2x1
jax: 0.10.0
libtpu: 0.0.40
codegen_flags: <defaults>
</compile_context>

<pallas_src>
import functools

import jax
import jax.numpy as jnp
from jax.experimental import pallas as pl
from jax.experimental.pallas import tpu as pltpu


def _conv3x3_kernel(w_ref, b_ref, x_ref, o_ref, *, N, C, CO, H, W):
    """3x3 / stride-1 / pad-1 conv on row-major-flattened, zero-padded images.

    w_ref: (CO*C*9,) f32, SMEM            -- OIHW weights, flattened (scalar reads)
    b_ref: (CO,)     f32, SMEM            -- bias
    x_ref: (N*C, (H+3)*(W+2)) f32, VMEM   -- padded inputs, spatial flattened
    o_ref: (N*CO, H*(W+2))    f32, VMEM   -- flat outputs (2 junk cols per row)
    """
    Wp = W + 2
    Lo = H * Wp

    for n in range(N):
        # One f32 accumulator per output channel; bias folded into the init.
        accs = [jnp.full((1, Lo), b_ref[co], dtype=jnp.float32) for co in range(CO)]

        for ci in range(C):
            row = n * C + ci
            for ky in range(3):
                for kx in range(3):
                    off = ky * Wp + kx
                    # Shifted window of this input channel: computed once and
                    # reused by every output channel (hoisted out of the co loop).
                    tap = x_ref[row:row + 1, off:off + Lo].astype(jnp.float32)
                    widx = ky * 3 + kx
                    for co in range(CO):
                        w = w_ref[(co * C + ci) * 9 + widx]
                        accs[co] = accs[co] + w * tap

        for co in range(CO):
            orow = n * CO + co
            o_ref[orow:orow + 1, :] = accs[co].astype(o_ref.dtype)


def conv2d_3x3_same(x, weight, bias):
    """PyTorch-equivalent nn.Conv2d(C, CO, kernel_size=3, stride=1, padding=1).

    x: (N, C, H, W) f32, weight: (CO, C, 3, 3) f32, bias: (CO,) f32
    returns (N, CO, H, W) f32
    """
    N, C, H, W = x.shape
    CO = weight.shape[0]
    Wp = W + 2
    Lo = H * Wp              # flat output length per (n, co), incl. 2 junk cols / row
    Lp = (H + 3) * Wp        # pad=1 all around + 1 extra zero bottom row, so every
                             # shifted window (max start offset 2*Wp + 2) is in bounds

    # Glue (plain JAX): zero padding, row-major spatial flatten, weight flatten.
    x_pad = jnp.pad(x, ((0, 0), (0, 0), (1, 2), (1, 1)))   # (N, C, H+3, W+2)
    x_flat = x_pad.reshape(N * C, Lp)
    w_flat = weight.reshape(-1)

    kernel = functools.partial(_conv3x3_kernel, N=N, C=C, CO=CO, H=H, W=W)

    out_flat = pl.pallas_call(
        kernel,
        out_shape=jax.ShapeDtypeStruct((N * CO, Lo), x.dtype),
        in_specs=[
            pl.BlockSpec(memory_space=pltpu.MemorySpace.SMEM),   # weights (scalars)
            pl.BlockSpec(memory_space=pltpu.MemorySpace.SMEM),   # bias (scalars)
            pl.BlockSpec(memory_space=pltpu.MemorySpace.VMEM),   # flattened padded input
        ],
        out_specs=pl.BlockSpec(memory_space=pltpu.MemorySpace.VMEM),
    )(w_flat, bias, x_flat)

    # Drop the 2 padded-width junk columns per row; restore NCHW.
    # NOTE: at real image sizes (H, W >> 16) this whole-batch block would need a
    # grid over N plus H-row tiling (1-row halo) to stay inside v7x's 64 MiB VMEM.
    return out_flat.reshape(N, CO, H, Wp)[:, :, :, :W]


if __name__ == "__main__":
    key = jax.random.PRNGKey(0)
    k_x, k_w, k_b = jax.random.split(key, 3)

    # Shapes implied by the module: C_in = C_out = 3; small N, H, W.
    N, C, H, W = 2, 3, 16, 16
    CO = 3

    x = jax.random.normal(k_x, (N, C, H, W), dtype=jnp.float32)

    # Module's deterministic init: weight = 1.0, bias = 0.0.
    weight = jnp.ones((CO, C, 3, 3), dtype=jnp.float32)
    bias = jnp.zeros((CO,), dtype=jnp.float32)

    out = jax.block_until_ready(conv2d_3x3_same(x, weight, bias))

    def conv_ref(x, w, b):
        y = jax.lax.conv_general_dilated(
            x, w, window_strides=(1, 1), padding="SAME",
            dimension_numbers=("NCHW", "OIHW", "NCHW"))
        return y + b.reshape(1, -1, 1, 1)

    assert out.shape == (N, CO, H, W)
    assert jnp.allclose(out, conv_ref(x, weight, bias), atol=1e-4, rtol=1e-4)

    # Extra check with random weight/bias to exercise the full index math.
    w_rand = jax.random.normal(k_w, (CO, C, 3, 3), dtype=jnp.float32)
    b_rand = jax.random.normal(k_b, (CO,), dtype=jnp.float32)
    out_rand = jax.block_until_ready(conv2d_3x3_same(x, w_rand, b_rand))
    assert jnp.allclose(out_rand, conv_ref(x, w_rand, b_rand), atol=1e-4, rtol=1e-4)

    print("KERNEL_OK")
</pallas_src>

<mosaic_0001>
module attributes {stable_mosaic.version = 11 : i64} {
  func.func @_conv3x3_kernel(%arg0: memref<81xf32, #tpu.memory_space<smem>>, %arg1: memref<3xf32, #tpu.memory_space<smem>>, %arg2: memref<6x342xf32, #tpu.memory_space<vmem>>, %arg3: memref<6x288xf32, #tpu.memory_space<vmem>>) attributes {dimension_semantics = [], scalar_prefetch = 0 : i64, scratch_operands = 0 : i64, tpu.core_type = #tpu.core_type<tc>} {
    %c0 = arith.constant 0 : index
    %0 = memref.load %arg1[%c0] : memref<3xf32, #tpu.memory_space<smem>>
    %1 = vector.broadcast %0 : f32 to vector<1x288xf32>
    %c1 = arith.constant 1 : index
    %2 = memref.load %arg1[%c1] : memref<3xf32, #tpu.memory_space<smem>>
    %3 = vector.broadcast %2 : f32 to vector<1x288xf32>
    %c2 = arith.constant 2 : index
    %4 = memref.load %arg1[%c2] : memref<3xf32, #tpu.memory_space<smem>>
    %5 = vector.broadcast %4 : f32 to vector<1x288xf32>
    %c0_0 = arith.constant 0 : index
    %c0_1 = arith.constant 0 : index
    %6 = vector.load %arg2[%c0_0, %c0_1] : memref<6x342xf32, #tpu.memory_space<vmem>>, vector<1x288xf32>
    %c0_2 = arith.constant 0 : index
    %7 = memref.load %arg0[%c0_2] : memref<81xf32, #tpu.memory_space<smem>>
    %8 = vector.broadcast %7 : f32 to vector<1x288xf32>
    %9 = arith.mulf %8, %6 : vector<1x288xf32>
    %10 = arith.addf %1, %9 : vector<1x288xf32>
    %c27 = arith.constant 27 : index
    %11 = memref.load %arg0[%c27] : memref<81xf32, #tpu.memory_space<smem>>
    %12 = vector.broadcast %11 : f32 to vector<1x288xf32>
    %13 = arith.mulf %12, %6 : vector<1x288xf32>
    %14 = arith.addf %3, %13 : vector<1x288xf32>
    %c54 = arith.constant 54 : index
    %15 = memref.load %arg0[%c54] : memref<81xf32, #tpu.memory_space<smem>>
    %16 = vector.broadcast %15 : f32 to vector<1x288xf32>
    %17 = arith.mulf %16, %6 : vector<1x288xf32>
    %18 = arith.addf %5, %17 : vector<1x288xf32>
    %c0_3 = arith.constant 0 : index
    %c1_4 = arith.constant 1 : index
    %19 = vector.load %arg2[%c0_3, %c1_4] : memref<6x342xf32, #tpu.memory_space<vmem>>, vector<1x288xf32>
    %c1_5 = arith.constant 1 : index
    %20 = memref.load %arg0[%c1_5] : memref<81xf32, #tpu.memory_space<smem>>
    %21 = vector.broadcast %20 : f32 to vector<1x288xf32>
    %22 = arith.mulf %21, %19 : vector<1x288xf32>
    %23 = arith.addf %10, %22 : vector<1x288xf32>
    %c28 = arith.constant 28 : index
    %24 = memref.load %arg0[%c28] : memref<81xf32, #tpu.memory_space<smem>>
    %25 = vector.broadcast %24 : f32 to vector<1x288xf32>
    %26 = arith.mulf %25, %19 : vector<1x288xf32>
    %27 = arith.addf %14, %26 : vector<1x288xf32>
    %c55 = arith.constant 55 : index
    %28 = memref.load %arg0[%c55] : memref<81xf32, #tpu.memory_space<smem>>
    %29 = vector.broadcast %28 : f32 to vector<1x288xf32>
    %30 = arith.mulf %29, %19 : vector<1x288xf32>
    %31 = arith.addf %18, %30 : vector<1x288xf32>
    %c0_6 = arith.constant 0 : index
    %c2_7 = arith.constant 2 : index
    %32 = vector.load %arg2[%c0_6, %c2_7] : memref<6x342xf32, #tpu.memory_space<vmem>>, vector<1x288xf32>
    %c2_8 = arith.constant 2 : index
    %33 = memref.load %arg0[%c2_8] : memref<81xf32, #tpu.memory_space<smem>>
    %34 = vector.broadcast %33 : f32 to vector<1x288xf32>
    %35 = arith.mulf %34, %32 : vector<1x288xf32>
    %36 = arith.addf %23, %35 : vector<1x288xf32>
    %c29 = arith.constant 29 : index
    %37 = memref.load %arg0[%c29] : memref<81xf32, #tpu.memory_space<smem>>
    %38 = vector.broadcast %37 : f32 to vector<1x288xf32>
    %39 = arith.mulf %38, %32 : vector<1x288xf32>
    %40 = arith.addf %27, %39 : vector<1x288xf32>
    %c56 = arith.constant 56 : index
    %41 = memref.load %arg0[%c56] : memref<81xf32, #tpu.memory_space<smem>>
    %42 = vector.broadcast %41 : f32 to vector<1x288xf32>
    %43 = arith.mulf %42, %32 : vector<1x288xf32>
    %44 = arith.addf %31, %43 : vector<1x288xf32>
    %c0_9 = arith.constant 0 : index
    %c18 = arith.constant 18 : index
    %45 = vector.load %arg2[%c0_9, %c18] : memref<6x342xf32, #tpu.memory_space<vmem>>, vector<1x288xf32>
    %c3 = arith.constant 3 : index
    %46 = memref.load %arg0[%c3] : memref<81xf32, #tpu.memory_space<smem>>
    %47 = vector.broadcast %46 : f32 to vector<1x288xf32>
    %48 = arith.mulf %47, %45 : vector<1x288xf32>
    %49 = arith.addf %36, %48 : vector<1x288xf32>
    %c30 = arith.constant 30 : index
    %50 = memref.load %arg0[%c30] : memref<81xf32, #tpu.memory_space<smem>>
    %51 = vector.broadcast %50 : f32 to vector<1x288xf32>
    %52 = arith.mulf %51, %45 : vector<1x288xf32>
    %53 = arith.addf %40, %52 : vector<1x288xf32>
    %c57 = arith.constant 57 : index
    %54 = memref.load %arg0[%c57] : memref<81xf32, #tpu.memory_space<smem>>
    %55 = vector.broadcast %54 : f32 to vector<1x288xf32>
    %56 = arith.mulf %55, %45 : vector<1x288xf32>
    %57 = arith.addf %44, %56 : vector<1x288xf32>
    %c0_10 = arith.constant 0 : index
    %c19 = arith.constant 19 : index
    %58 = vector.load %arg2[%c0_10, %c19] : memref<6x342xf32, #tpu.memory_space<vmem>>, vector<1x288xf32>
    %c4 = arith.constant 4 : index
    %59 = memref.load %arg0[%c4] : memref<81xf32, #tpu.memory_space<smem>>
    %60 = vector.broadcast %59 : f32 to vector<1x288xf32>
    %61 = arith.mulf %60, %58 : vector<1x288xf32>
    %62 = arith.addf %49, %61 : vector<1x288xf32>
    %c31 = arith.constant 31 : index
    %63 = memref.load %arg0[%c31] : memref<81xf32, #tpu.memory_space<smem>>
    %64 = vector.broadcast %63 : f32 to vector<1x288xf32>
    %65 = arith.mulf %64, %58 : vector<1x288xf32>
    %66 = arith.addf %53, %65 : vector<1x288xf32>
    %c58 = arith.constant 58 : index
    %67 = memref.load %arg0[%c58] : memref<81xf32, #tpu.memory_space<smem>>
    %68 = vector.broadcast %67 : f32 to vector<1x288xf32>
    %69 = arith.mulf %68, %58 : vector<1x288xf32>
    %70 = arith.addf %57, %69 : vector<1x288xf32>
    %c0_11 = arith.constant 0 : index
    %c20 = arith.constant 20 : index
    %71 = vector.load %arg2[%c0_11, %c20] : memref<6x342xf32, #tpu.memory_space<vmem>>, vector<1x288xf32>
    %c5 = arith.constant 5 : index
    %72 = memref.load %arg0[%c5] : memref<81xf32, #tpu.memory_space<smem>>
    %73 = vector.broadcast %72 : f32 to vector<1x288xf32>
    %74 = arith.mulf %73, %71 : vector<1x288xf32>
    %75 = arith.addf %62, %74 : vector<1x288xf32>
    %c32 = arith.constant 32 : index
    %76 = memref.load %arg0[%c32] : memref<81xf32, #tpu.memory_space<smem>>
    %77 = vector.broadcast %76 : f32 to vector<1x288xf32>
    %78 = arith.mulf %77, %71 : vector<1x288xf32>
    %79 = arith.addf %66, %78 : vector<1x288xf32>
    %c59 = arith.constant 59 : index
    %80 = memref.load %arg0[%c59] : memref<81xf32, #tpu.memory_space<smem>>
    %81 = vector.broadcast %80 : f32 to vector<1x288xf32>
    %82 = arith.mulf %81, %71 : vector<1x288xf32>
    %83 = arith.addf %70, %82 : vector<1x288xf32>
    %c0_12 = arith.constant 0 : index
    %c36 = arith.constant 36 : index
    %84 = vector.load %arg2[%c0_12, %c36] : memref<6x342xf32, #tpu.memory_space<vmem>>, vector<1x288xf32>
    %c6 = arith.constant 6 : index
    %85 = memref.load %arg0[%c6] : memref<81xf32, #tpu.memory_space<smem>>
    %86 = vector.broadcast %85 : f32 to vector<1x288xf32>
    %87 = arith.mulf %86, %84 : vector<1x288xf32>
    %88 = arith.addf %75, %87 : vector<1x288xf32>
    %c33 = arith.constant 33 : index
    %89 = memref.load %arg0[%c33] : memref<81xf32, #tpu.memory_space<smem>>
    %90 = vector.broadcast %89 : f32 to vector<1x288xf32>
    %91 = arith.mulf %90, %84 : vector<1x288xf32>
    %92 = arith.addf %79, %91 : vector<1x288xf32>
    %c60 = arith.constant 60 : index
    %93 = memref.load %arg0[%c60] : memref<81xf32, #tpu.memory_space<smem>>
    %94 = vector.broadcast %93 : f32 to vector<1x288xf32>
    %95 = arith.mulf %94, %84 : vector<1x288xf32>
    %96 = arith.addf %83, %95 : vector<1x288xf32>
    %c0_13 = arith.constant 0 : index
    %c37 = arith.constant 37 : index
    %97 = vector.load %arg2[%c0_13, %c37] : memref<6x342xf32, #tpu.memory_space<vmem>>, vector<1x288xf32>
    %c7 = arith.constant 7 : index
    %98 = memref.load %arg0[%c7] : memref<81xf32, #tpu.memory_space<smem>>
    %99 = vector.broadcast %98 : f32 to vector<1x288xf32>
    %100 = arith.mulf %99, %97 : vector<1x288xf32>
    %101 = arith.addf %88, %100 : vector<1x288xf32>
    %c34 = arith.constant 34 : index
    %102 = memref.load %arg0[%c34] : memref<81xf32, #tpu.memory_space<smem>>
    %103 = vector.broadcast %102 : f32 to vector<1x288xf32>
    %104 = arith.mulf %103, %97 : vector<1x288xf32>
    %105 = arith.addf %92, %104 : vector<1x288xf32>
    %c61 = arith.constant 61 : index
    %106 = memref.load %arg0[%c61] : memref<81xf32, #tpu.memory_space<smem>>
    %107 = vector.broadcast %106 : f32 to vector<1x288xf32>
    %108 = arith.mulf %107, %97 : vector<1x288xf32>
    %109 = arith.addf %96, %108 : vector<1x288xf32>
    %c0_14 = arith.constant 0 : index
    %c38 = arith.constant 38 : index
    %110 = vector.load %arg2[%c0_14, %c38] : memref<6x342xf32, #tpu.memory_space<vmem>>, vector<1x288xf32>
    %c8 = arith.constant 8 : index
    %111 = memref.load %arg0[%c8] : memref<81xf32, #tpu.memory_space<smem>>
    %112 = vector.broadcast %111 : f32 to vector<1x288xf32>
    %113 = arith.mulf %112, %110 : vector<1x288xf32>
    %114 = arith.addf %101, %113 : vector<1x288xf32>
    %c35 = arith.constant 35 : index
    %115 = memref.load %arg0[%c35] : memref<81xf32, #tpu.memory_space<smem>>
    %116 = vector.broadcast %115 : f32 to vector<1x288xf32>
    %117 = arith.mulf %116, %110 : vector<1x288xf32>
    %118 = arith.addf %105, %117 : vector<1x288xf32>
    %c62 = arith.constant 62 : index
    %119 = memref.load %arg0[%c62] : memref<81xf32, #tpu.memory_space<smem>>
    %120 = vector.broadcast %119 : f32 to vector<1x288xf32>
    %121 = arith.mulf %120, %110 : vector<1x288xf32>
    %122 = arith.addf %109, %121 : vector<1x288xf32>
    %c1_15 = arith.constant 1 : index
    %c0_16 = arith.constant 0 : index
    %123 = vector.load %arg2[%c1_15, %c0_16] : memref<6x342xf32, #tpu.memory_space<vmem>>, vector<1x288xf32>
    %c9 = arith.constant 9 : index
    %124 = memref.load %arg0[%c9] : memref<81xf32, #tpu.memory_space<smem>>
    %125 = vector.broadcast %124 : f32 to vector<1x288xf32>
    %126 = arith.mulf %125, %123 : vector<1x288xf32>
    %127 = arith.addf %114, %126 : vector<1x288xf32>
    %c36_17 = arith.constant 36 : index
    %128 = memref.load %arg0[%c36_17] : memref<81xf32, #tpu.memory_space<smem>>
    %129 = vector.broadcast %128 : f32 to vector<1x288xf32>
    %130 = arith.mulf %129, %123 : vector<1x288xf32>
    %131 = arith.addf %118, %130 : vector<1x288xf32>
    %c63 = arith.constant 63 : index
    %132 = memref.load %arg0[%c63] : memref<81xf32, #tpu.memory_space<smem>>
    %133 = vector.broadcast %132 : f32 to vector<1x288xf32>
    %134 = arith.mulf %133, %123 : vector<1x288xf32>
    %135 = arith.addf %122, %134 : vector<1x288xf32>
    %c1_18 = arith.constant 1 : index
    %c1_19 = arith.constant 1 : index
    %136 = vector.load %arg2[%c1_18, %c1_19] : memref<6x342xf32, #tpu.memory_space<vmem>>, vector<1x288xf32>
    %c10 = arith.constant 10 : index
    %137 = memref.load %arg0[%c10] : memref<81xf32, #tpu.memory_space<smem>>
    %138 = vector.broadcast %137 : f32 to vector<1x288xf32>
    %139 = arith.mulf %138, %136 : vector<1x288xf32>
    %140 = arith.addf %127, %139 : vector<1x288xf32>
    %c37_20 = arith.constant 37 : index
    %141 = memref.load %arg0[%c37_20] : memref<81xf32, #tpu.memory_space<smem>>
    %142 = vector.broadcast %141 : f32 to vector<1x288xf32>
    %143 = arith.mulf %142, %136 : vector<1x288xf32>
    %144 = arith.addf %131, %143 : vector<1x288xf32>
    %c64 = arith.constant 64 : index
    %145 = memref.load %arg0[%c64] : memref<81xf32, #tpu.memory_space<smem>>
    %146 = vector.broadcast %145 : f32 to vector<1x288xf32>
    %147 = arith.mulf %146, %136 : vector<1x288xf32>
    %148 = arith.addf %135, %147 : vector<1x288xf32>
    %c1_21 = arith.constant 1 : index
    %c2_22 = arith.constant 2 : index
    %149 = vector.load %arg2[%c1_21, %c2_22] : memref<6x342xf32, #tpu.memory_space<vmem>>, vector<1x288xf32>
    %c11 = arith.constant 11 : index
    %150 = memref.load %arg0[%c11] : memref<81xf32, #tpu.memory_space<smem>>
    %151 = vector.broadcast %150 : f32 to vector<1x288xf32>
    %152 = arith.mulf %151, %149 : vector<1x288xf32>
    %153 = arith.addf %140, %152 : vector<1x288xf32>
    %c38_23 = arith.constant 38 : index
    %154 = memref.load %arg0[%c38_23] : memref<81xf32, #tpu.memory_space<smem>>
    %155 = vector.broadcast %154 : f32 to vector<1x288xf32>
    %156 = arith.mulf %155, %149 : vector<1x288xf32>
    %157 = arith.addf %144, %156 : vector<1x288xf32>
    %c65 = arith.constant 65 : index
    %158 = memref.load %arg0[%c65] : memref<81xf32, #tpu.memory_space<smem>>
    %159 = vector.broadcast %158 : f32 to vector<1x288xf32>
    %160 = arith.mulf %159, %149 : vector<1x288xf32>
    %161 = arith.addf %148, %160 : vector<1x288xf32>
    %c1_24 = arith.constant 1 : index
    %c18_25 = arith.constant 18 : index
    %162 = vector.load %arg2[%c1_24, %c18_25] : memref<6x342xf32, #tpu.memory_space<vmem>>, vector<1x288xf32>
    %c12 = arith.constant 12 : index
    %163 = memref.load %arg0[%c12] : memref<81xf32, #tpu.memory_space<smem>>
    %164 = vector.broadcast %163 : f32 to vector<1x288xf32>
    %165 = arith.mulf %164, %162 : vector<1x288xf32>
    %166 = arith.addf %153, %165 : vector<1x288xf32>
    %c39 = arith.constant 39 : index
    %167 = memref.load %arg0[%c39] : memref<81xf32, #tpu.memory_space<smem>>
    %168 = vector.broadcast %167 : f32 to vector<1x288xf32>
    %169 = arith.mulf %168, %162 : vector<1x288xf32>
    %170 = arith.addf %157, %169 : vector<1x288xf32>
    %c66 = arith.constant 66 : index
    %171 = memref.load %arg0[%c66] : memref<81xf32, #tpu.memory_space<smem>>
    %172 = vector.broadcast %171 : f32 to vector<1x288xf32>
    %173 = arith.mulf %172, %162 : vector<1x288xf32>
    %174 = arith.addf %161, %173 : vector<1x288xf32>
    %c1_26 = arith.constant 1 : index
    %c19_27 = arith.constant 19 : index
    %175 = vector.load %arg2[%c1_26, %c19_27] : memref<6x342xf32, #tpu.memory_space<vmem>>, vector<1x288xf32>
    %c13 = arith.constant 13 : index
    %176 = memref.load %arg0[%c13] : memref<81xf32, #tpu.memory_space<smem>>
    %177 = vector.broadcast %176 : f32 to vector<1x288xf32>
    %178 = arith.mulf %177, %175 : vector<1x288xf32>
    %179 = arith.addf %166, %178 : vector<1x288xf32>
    %c40 = arith.constant 40 : index
    %180 = memref.load %arg0[%c40] : memref<81xf32, #tpu.memory_space<smem>>
    %181 = vector.broadcast %180 : f32 to vector<1x288xf32>
    %182 = arith.mulf %181, %175 : vector<1x288xf32>
    %183 = arith.addf %170, %182 : vector<1x288xf32>
    %c67 = arith.constant 67 : index
    %184 = memref.load %arg0[%c67] : memref<81xf32, #tpu.memory_space<smem>>
    %185 = vector.broadcast %184 : f32 to vector<1x288xf32>
    %186 = arith.mulf %185, %175 : vector<1x288xf32>
    %187 = arith.addf %174, %186 : vector<1x288xf32>
    %c1_28 = arith.constant 1 : index
    %c20_29 = arith.constant 20 : index
    %188 = vector.load %arg2[%c1_28, %c20_29] : memref<6x342xf32, #tpu.memory_space<vmem>>, vector<1x288xf32>
    %c14 = arith.constant 14 : index
    %189 = memref.load %arg0[%c14] : memref<81xf32, #tpu.memory_space<smem>>
    %190 = vector.broadcast %189 : f32 to vector<1x288xf32>
    %191 = arith.mulf %190, %188 : vector<1x288xf32>
    %192 = arith.addf %179, %191 : vector<1x288xf32>
    %c41 = arith.constant 41 : index
    %193 = memref.load %arg0[%c41] : memref<81xf32, #tpu.memory_space<smem>>
    %194 = vector.broadcast %193 : f32 to vector<1x288xf32>
    %195 = arith.mulf %194, %188 : vector<1x288xf32>
    %196 = arith.addf %183, %195 : vector<1x288xf32>
    %c68 = arith.constant 68 : index
    %197 = memref.load %arg0[%c68] : memref<81xf32, #tpu.memory_space<smem>>
    %198 = vector.broadcast %197 : f32 to vector<1x288xf32>
    %199 = arith.mulf %198, %188 : vector<1x288xf32>
    %200 = arith.addf %187, %199 : vector<1x288xf32>
    %c1_30 = arith.constant 1 : index
    %c36_31 = arith.constant 36 : index
    %201 = vector.load %arg2[%c1_30, %c36_31] : memref<6x342xf32, #tpu.memory_space<vmem>>, vector<1x288xf32>
    %c15 = arith.constant 15 : index
    %202 = memref.load %arg0[%c15] : memref<81xf32, #tpu.memory_space<smem>>
    %203 = vector.broadcast %202 : f32 to vector<1x288xf32>
    %204 = arith.mulf %203, %201 : vector<1x288xf32>
    %205 = arith.addf %192, %204 : vector<1x288xf32>
    %c42 = arith.constant 42 : index
    %206 = memref.load %arg0[%c42] : memref<81xf32, #tpu.memory_space<smem>>
    %207 = vector.broadcast %206 : f32 to vector<1x288xf32>
    %208 = arith.mulf %207, %201 : vector<1x288xf32>
    %209 = arith.addf %196, %208 : vector<1x288xf32>
    %c69 = arith.constant 69 : index
    %210 = memref.load %arg0[%c69] : memref<81xf32, #tpu.memory_space<smem>>
    %211 = vector.broadcast %210 : f32 to vector<1x288xf32>
    %212 = arith.mulf %211, %201 : vector<1x288xf32>
    %213 = arith.addf %200, %212 : vector<1x288xf32>
    %c1_32 = arith.constant 1 : index
    %c37_33 = arith.constant 37 : index
    %214 = vector.load %arg2[%c1_32, %c37_33] : memref<6x342xf32, #tpu.memory_space<vmem>>, vector<1x288xf32>
    %c16 = arith.constant 16 : index
    %215 = memref.load %arg0[%c16] : memref<81xf32, #tpu.memory_space<smem>>
    %216 = vector.broadcast %215 : f32 to vector<1x288xf32>
    %217 = arith.mulf %216, %214 : vector<1x288xf32>
    %218 = arith.addf %205, %217 : vector<1x288xf32>
    %c43 = arith.constant 43 : index
    %219 = memref.load %arg0[%c43] : memref<81xf32, #tpu.memory_space<smem>>
    %220 = vector.broadcast %219 : f32 to vector<1x288xf32>
    %221 = arith.mulf %220, %214 : vector<1x288xf32>
    %222 = arith.addf %209, %221 : vector<1x288xf32>
    %c70 = arith.constant 70 : index
    %223 = memref.load %arg0[%c70] : memref<81xf32, #tpu.memory_space<smem>>
    %224 = vector.broadcast %223 : f32 to vector<1x288xf32>
    %225 = arith.mulf %224, %214 : vector<1x288xf32>
    %226 = arith.addf %213, %225 : vector<1x288xf32>
    %c1_34 = arith.constant 1 : index
    %c38_35 = arith.constant 38 : index
    %227 = vector.load %arg2[%c1_34, %c38_35] : memref<6x342xf32, #tpu.memory_space<vmem>>, vector<1x288xf32>
    %c17 = arith.constant 17 : index
    %228 = memref.load %arg0[%c17] : memref<81xf32, #tpu.memory_space<smem>>
    %229 = vector.broadcast %228 : f32 to vector<1x288xf32>
    %230 = arith.mulf %229, %227 : vector<1x288xf32>
    %231 = arith.addf %218, %230 : vector<1x288xf32>
    %c44 = arith.constant 44 : index
    %232 = memref.load %arg0[%c44] : memref<81xf32, #tpu.memory_space<smem>>
    %233 = vector.broadcast %232 : f32 to vector<1x288xf32>
    %234 = arith.mulf %233, %227 : vector<1x288xf32>
    %235 = arith.addf %222, %234 : vector<1x288xf32>
    %c71 = arith.constant 71 : index
    %236 = memref.load %arg0[%c71] : memref<81xf32, #tpu.memory_space<smem>>
    %237 = vector.broadcast %236 : f32 to vector<1x288xf32>
    %238 = arith.mulf %237, %227 : vector<1x288xf32>
    %239 = arith.addf %226, %238 : vector<1x288xf32>
    %c2_36 = arith.constant 2 : index
    %c0_37 = arith.constant 0 : index
    %240 = vector.load %arg2[%c2_36, %c0_37] : memref<6x342xf32, #tpu.memory_space<vmem>>, vector<1x288xf32>
    %c18_38 = arith.constant 18 : index
    %241 = memref.load %arg0[%c18_38] : memref<81xf32, #tpu.memory_space<smem>>
    %242 = vector.broadcast %241 : f32 to vector<1x288xf32>
    %243 = arith.mulf %242, %240 : vector<1x288xf32>
    %244 = arith.addf %231, %243 : vector<1x288xf32>
    %c45 = arith.constant 45 : index
    %245 = memref.load %arg0[%c45] : memref<81xf32, #tpu.memory_space<smem>>
    %246 = vector.broadcast %245 : f32 to vector<1x288xf32>
    %247 = arith.mulf %246, %240 : vector<1x288xf32>
    %248 = arith.addf %235, %247 : vector<1x288xf32>
    %c72 = arith.constant 72 : index
    %249 = memref.load %arg0[%c72] : memref<81xf32, #tpu.memory_space<smem>>
    %250 = vector.broadcast %249 : f32 to vector<1x288xf32>
    %251 = arith.mulf %250, %240 : vector<1x288xf32>
    %252 = arith.addf %239, %251 : vector<1x288xf32>
    %c2_39 = arith.constant 2 : index
    %c1_40 = arith.constant 1 : index
    %253 = vector.load %arg2[%c2_39, %c1_40] : memref<6x342xf32, #tpu.memory_space<vmem>>, vector<1x288xf32>
    %c19_41 = arith.constant 19 : index
    %254 = memref.load %arg0[%c19_41] : memref<81xf32, #tpu.memory_space<smem>>
    %255 = vector.broadcast %254 : f32 to vector<1x288xf32>
    %256 = arith.mulf %255, %253 : vector<1x288xf32>
    %257 = arith.addf %244, %256 : vector<1x288xf32>
    %c46 = arith.constant 46 : index
    %258 = memref.load %arg0[%c46] : memref<81xf32, #tpu.memory_space<smem>>
    %259 = vector.broadcast %258 : f32 to vector<1x288xf32>
    %260 = arith.mulf %259, %253 : vector<1x288xf32>
    %261 = arith.addf %248, %260 : vector<1x288xf32>
    %c73 = arith.constant 73 : index
    %262 = memref.load %arg0[%c73] : memref<81xf32, #tpu.memory_space<smem>>
    %263 = vector.broadcast %262 : f32 to vector<1x288xf32>
    %264 = arith.mulf %263, %253 : vector<1x288xf32>
    %265 = arith.addf %252, %264 : vector<1x288xf32>
    %c2_42 = arith.constant 2 : index
    %c2_43 = arith.constant 2 : index
    %266 = vector.load %arg2[%c2_42, %c2_43] : memref<6x342xf32, #tpu.memory_space<vmem>>, vector<1x288xf32>
    %c20_44 = arith.constant 20 : index
    %267 = memref.load %arg0[%c20_44] : memref<81xf32, #tpu.memory_space<smem>>
    %268 = vector.broadcast %267 : f32 to vector<1x288xf32>
    %269 = arith.mulf %268, %266 : vector<1x288xf32>
    %270 = arith.addf %257, %269 : vector<1x288xf32>
    %c47 = arith.constant 47 : index
    %271 = memref.load %arg0[%c47] : memref<81xf32, #tpu.memory_space<smem>>
    %272 = vector.broadcast %271 : f32 to vector<1x288xf32>
    %273 = arith.mulf %272, %266 : vector<1x288xf32>
    %274 = arith.addf %261, %273 : vector<1x288xf32>
    %c74 = arith.constant 74 : index
    %275 = memref.load %arg0[%c74] : memref<81xf32, #tpu.memory_space<smem>>
    %276 = vector.broadcast %275 : f32 to vector<1x288xf32>
    %277 = arith.mulf %276, %266 : vector<1x288xf32>
    %278 = arith.addf %265, %277 : vector<1x288xf32>
    %c2_45 = arith.constant 2 : index
    %c18_46 = arith.constant 18 : index
    %279 = vector.load %arg2[%c2_45, %c18_46] : memref<6x342xf32, #tpu.memory_space<vmem>>, vector<1x288xf32>
    %c21 = arith.constant 21 : index
    %280 = memref.load %arg0[%c21] : memref<81xf32, #tpu.memory_space<smem>>
    %281 = vector.broadcast %280 : f32 to vector<1x288xf32>
    %282 = arith.mulf %281, %279 : vector<1x288xf32>
    %283 = arith.addf %270, %282 : vector<1x288xf32>
    %c48 = arith.constant 48 : index
    %284 = memref.load %arg0[%c48] : memref<81xf32, #tpu.memory_space<smem>>
    %285 = vector.broadcast %284 : f32 to vector<1x288xf32>
    %286 = arith.mulf %285, %279 : vector<1x288xf32>
    %287 = arith.addf %274, %286 : vector<1x288xf32>
    %c75 = arith.constant 75 : index
    %288 = memref.load %arg0[%c75] : memref<81xf32, #tpu.memory_space<smem>>
    %289 = vector.broadcast %288 : f32 to vector<1x288xf32>
    %290 = arith.mulf %289, %279 : vector<1x288xf32>
    %291 = arith.addf %278, %290 : vector<1x288xf32>
    %c2_47 = arith.constant 2 : index
    %c19_48 = arith.constant 19 : index
    %292 = vector.load %arg2[%c2_47, %c19_48] : memref<6x342xf32, #tpu.memory_space<vmem>>, vector<1x288xf32>
    %c22 = arith.constant 22 : index
    %293 = memref.load %arg0[%c22] : memref<81xf32, #tpu.memory_space<smem>>
    %294 = vector.broadcast %293 : f32 to vector<1x288xf32>
    %295 = arith.mulf %294, %292 : vector<1x288xf32>
    %296 = arith.addf %283, %295 : vector<1x288xf32>
    %c49 = arith.constant 49 : index
    %297 = memref.load %arg0[%c49] : memref<81xf32, #tpu.memory_space<smem>>
    %298 = vector.broadcast %297 : f32 to vector<1x288xf32>
    %299 = arith.mulf %298, %292 : vector<1x288xf32>
    %300 = arith.addf %287, %299 : vector<1x288xf32>
    %c76 = arith.constant 76 : index
    %301 = memref.load %arg0[%c76] : memref<81xf32, #tpu.memory_space<smem>>
    %302 = vector.broadcast %301 : f32 to vector<1x288xf32>
    %303 = arith.mulf %302, %292 : vector<1x288xf32>
    %304 = arith.addf %291, %303 : vector<1x288xf32>
    %c2_49 = arith.constant 2 : index
    %c20_50 = arith.constant 20 : index
    %305 = vector.load %arg2[%c2_49, %c20_50] : memref<6x342xf32, #tpu.memory_space<vmem>>, vector<1x288xf32>
    %c23 = arith.constant 23 : index
    %306 = memref.load %arg0[%c23] : memref<81xf32, #tpu.memory_space<smem>>
    %307 = vector.broadcast %306 : f32 to vector<1x288xf32>
    %308 = arith.mulf %307, %305 : vector<1x288xf32>
    %309 = arith.addf %296, %308 : vector<1x288xf32>
    %c50 = arith.constant 50 : index
    %310 = memref.load %arg0[%c50] : memref<81xf32, #tpu.memory_space<smem>>
    %311 = vector.broadcast %310 : f32 to vector<1x288xf32>
    %312 = arith.mulf %311, %305 : vector<1x288xf32>
    %313 = arith.addf %300, %312 : vector<1x288xf32>
    %c77 = arith.constant 77 : index
    %314 = memref.load %arg0[%c77] : memref<81xf32, #tpu.memory_space<smem>>
    %315 = vector.broadcast %314 : f32 to vector<1x288xf32>
    %316 = arith.mulf %315, %305 : vector<1x288xf32>
    %317 = arith.addf %304, %316 : vector<1x288xf32>
    %c2_51 = arith.constant 2 : index
    %c36_52 = arith.constant 36 : index
    %318 = vector.load %arg2[%c2_51, %c36_52] : memref<6x342xf32, #tpu.memory_space<vmem>>, vector<1x288xf32>
    %c24 = arith.constant 24 : index
    %319 = memref.load %arg0[%c24] : memref<81xf32, #tpu.memory_space<smem>>
    %320 = vector.broadcast %319 : f32 to vector<1x288xf32>
    %321 = arith.mulf %320, %318 : vector<1x288xf32>
    %322 = arith.addf %309, %321 : vector<1x288xf32>
    %c51 = arith.constant 51 : index
    %323 = memref.load %arg0[%c51] : memref<81xf32, #tpu.memory_space<smem>>
    %324 = vector.broadcast %323 : f32 to vector<1x288xf32>
    %325 = arith.mulf %324, %318 : vector<1x288xf32>
    %326 = arith.addf %313, %325 : vector<1x288xf32>
    %c78 = arith.constant 78 : index
    %327 = memref.load %arg0[%c78] : memref<81xf32, #tpu.memory_space<smem>>
    %328 = vector.broadcast %327 : f32 to vector<1x288xf32>
    %329 = arith.mulf %328, %318 : vector<1x288xf32>
    %330 = arith.addf %317, %329 : vector<1x288xf32>
    %c2_53 = arith.constant 2 : index
    %c37_54 = arith.constant 37 : index
    %331 = vector.load %arg2[%c2_53, %c37_54] : memref<6x342xf32, #tpu.memory_space<vmem>>, vector<1x288xf32>
    %c25 = arith.constant 25 : index
    %332 = memref.load %arg0[%c25] : memref<81xf32, #tpu.memory_space<smem>>
    %333 = vector.broadcast %332 : f32 to vector<1x288xf32>
    %334 = arith.mulf %333, %331 : vector<1x288xf32>
    %335 = arith.addf %322, %334 : vector<1x288xf32>
    %c52 = arith.constant 52 : index
    %336 = memref.load %arg0[%c52] : memref<81xf32, #tpu.memory_space<smem>>
    %337 = vector.broadcast %336 : f32 to vector<1x288xf32>
    %338 = arith.mulf %337, %331 : vector<1x288xf32>
    %339 = arith.addf %326, %338 : vector<1x288xf32>
    %c79 = arith.constant 79 : index
    %340 = memref.load %arg0[%c79] : memref<81xf32, #tpu.memory_space<smem>>
    %341 = vector.broadcast %340 : f32 to vector<1x288xf32>
    %342 = arith.mulf %341, %331 : vector<1x288xf32>
    %343 = arith.addf %330, %342 : vector<1x288xf32>
    %c2_55 = arith.constant 2 : index
    %c38_56 = arith.constant 38 : index
    %344 = vector.load %arg2[%c2_55, %c38_56] : memref<6x342xf32, #tpu.memory_space<vmem>>, vector<1x288xf32>
    %c26 = arith.constant 26 : index
    %345 = memref.load %arg0[%c26] : memref<81xf32, #tpu.memory_space<smem>>
    %346 = vector.broadcast %345 : f32 to vector<1x288xf32>
    %347 = arith.mulf %346, %344 : vector<1x288xf32>
    %348 = arith.addf %335, %347 : vector<1x288xf32>
    %c53 = arith.constant 53 : index
    %349 = memref.load %arg0[%c53] : memref<81xf32, #tpu.memory_space<smem>>
    %350 = vector.broadcast %349 : f32 to vector<1x288xf32>
    %351 = arith.mulf %350, %344 : vector<1x288xf32>
    %352 = arith.addf %339, %351 : vector<1x288xf32>
    %c80 = arith.constant 80 : index
    %353 = memref.load %arg0[%c80] : memref<81xf32, #tpu.memory_space<smem>>
    %354 = vector.broadcast %353 : f32 to vector<1x288xf32>
    %355 = arith.mulf %354, %344 : vector<1x288xf32>
    %356 = arith.addf %343, %355 : vector<1x288xf32>
    %c0_57 = arith.constant 0 : index
    %c0_58 = arith.constant 0 : index
    %357 = vector.load %arg3[%c0_57, %c0_58] : memref<6x288xf32, #tpu.memory_space<vmem>>, vector<1x288xf32>
    tpu.vector_store %arg3[%c0_57, %c0_58], %348 {strides = array<i32>} : memref<6x288xf32, #tpu.memory_space<vmem>>, vector<1x288xf32>,
    %c1_59 = arith.constant 1 : index
    %c0_60 = arith.constant 0 : index
    %358 = vector.load %arg3[%c1_59, %c0_60] : memref<6x288xf32, #tpu.memory_space<vmem>>, vector<1x288xf32>
    tpu.vector_store %arg3[%c1_59, %c0_60], %352 {strides = array<i32>} : memref<6x288xf32, #tpu.memory_space<vmem>>, vector<1x288xf32>,
    %c2_61 = arith.constant 2 : index
    %c0_62 = arith.constant 0 : index
    %359 = vector.load %arg3[%c2_61, %c0_62] : memref<6x288xf32, #tpu.memory_space<vmem>>, vector<1x288xf32>
    tpu.vector_store %arg3[%c2_61, %c0_62], %356 {strides = array<i32>} : memref<6x288xf32, #tpu.memory_space<vmem>>, vector<1x288xf32>,
    %c0_63 = arith.constant 0 : index
    %360 = memref.load %arg1[%c0_63] : memref<3xf32, #tpu.memory_space<smem>>
    %361 = vector.broadcast %360 : f32 to vector<1x288xf32>
    %c1_64 = arith.constant 1 : index
    %362 = memref.load %arg1[%c1_64] : memref<3xf32, #tpu.memory_space<smem>>
    %363 = vector.broadcast %362 : f32 to vector<1x288xf32>
    %c2_65 = arith.constant 2 : index
    %364 = memref.load %arg1[%c2_65] : memref<3xf32, #tpu.memory_space<smem>>
    %365 = vector.broadcast %364 : f32 to vector<1x288xf32>
    %c3_66 = arith.constant 3 : index
    %c0_67 = arith.constant 0 : index
    %366 = vector.load %arg2[%c3_66, %c0_67] : memref<6x342xf32, #tpu.memory_space<vmem>>, vector<1x288xf32>
    %c0_68 = arith.constant 0 : index
    %367 = memref.load %arg0[%c0_68] : memref<81xf32, #tpu.memory_space<smem>>
    %368 = vector.broadcast %367 : f32 to vector<1x288xf32>
    %369 = arith.mulf %368, %366 : vector<1x288xf32>
    %370 = arith.addf %361, %369 : vector<1x288xf32>
    %c27_69 = arith.constant 27 : index
    %371 = memref.load %arg0[%c27_69] : memref<81xf32, #tpu.memory_space<smem>>
    %372 = vector.broadcast %371 : f32 to vector<1x288xf32>
    %373 = arith.mulf %372, %366 : vector<1x288xf32>
    %374 = arith.addf %363, %373 : vector<1x288xf32>
    %c54_70 = arith.constant 54 : index
    %375 = memref.load %arg0[%c54_70] : memref<81xf32, #tpu.memory_space<smem>>
    %376 = vector.broadcast %375 : f32 to vector<1x288xf32>
    %377 = arith.mulf %376, %366 : vector<1x288xf32>
    %378 = arith.addf %365, %377 : vector<1x288xf32>
    %c3_71 = arith.constant 3 : index
    %c1_72 = arith.constant 1 : index
    %379 = vector.load %arg2[%c3_71, %c1_72] : memref<6x342xf32, #tpu.memory_space<vmem>>, vector<1x288xf32>
    %c1_73 = arith.constant 1 : index
    %380 = memref.load %arg0[%c1_73] : memref<81xf32, #tpu.memory_space<smem>>
    %381 = vector.broadcast %380 : f32 to vector<1x288xf32>
    %382 = arith.mulf %381, %379 : vector<1x288xf32>
    %383 = arith.addf %370, %382 : vector<1x288xf32>
    %c28_74 = arith.constant 28 : index
    %384 = memref.load %arg0[%c28_74] : memref<81xf32, #tpu.memory_space<smem>>
    %385 = vector.broadcast %384 : f32 to vector<1x288xf32>
    %386 = arith.mulf %385, %379 : vector<1x288xf32>
    %387 = arith.addf %374, %386 : vector<1x288xf32>
    %c55_75 = arith.constant 55 : index
    %388 = memref.load %arg0[%c55_75] : memref<81xf32, #tpu.memory_space<smem>>
    %389 = vector.broadcast %388 : f32 to vector<1x288xf32>
    %390 = arith.mulf %389, %379 : vector<1x288xf32>
    %391 = arith.addf %378, %390 : vector<1x288xf32>
    %c3_76 = arith.constant 3 : index
    %c2_77 = arith.constant 2 : index
    %392 = vector.load %arg2[%c3_76, %c2_77] : memref<6x342xf32, #tpu.memory_space<vmem>>, vector<1x288xf32>
    %c2_78 = arith.constant 2 : index
    %393 = memref.load %arg0[%c2_78] : memref<81xf32, #tpu.memory_space<smem>>
    %394 = vector.broadcast %393 : f32 to vector<1x288xf32>
    %395 = arith.mulf %394, %392 : vector<1x288xf32>
    %396 = arith.addf %383, %395 : vector<1x288xf32>
    %c29_79 = arith.constant 29 : index
    %397 = memref.load %arg0[%c29_79] : memref<81xf32, #tpu.memory_space<smem>>
    %398 = vector.broadcast %397 : f32 to vector<1x288xf32>
    %399 = arith.mulf %398, %392 : vector<1x288xf32>
    %400 = arith.addf %387, %399 : vector<1x288xf32>
    %c56_80 = arith.constant 56 : index
    %401 = memref.load %arg0[%c56_80] : memref<81xf32, #tpu.memory_space<smem>>
    %402 = vector.broadcast %401 : f32 to vector<1x288xf32>
    %403 = arith.mulf %402, %392 : vector<1x288xf32>
    %404 = arith.addf %391, %403 : vector<1x288xf32>
    %c3_81 = arith.constant 3 : index
    %c18_82 = arith.constant 18 : index
    %405 = vector.load %arg2[%c3_81, %c18_82] : memref<6x342xf32, #tpu.memory_space<vmem>>, vector<1x288xf32>
    %c3_83 = arith.constant 3 : index
    %406 = memref.load %arg0[%c3_83] : memref<81xf32, #tpu.memory_space<smem>>
    %407 = vector.broadcast %406 : f32 to vector<1x288xf32>
    %408 = arith.mulf %407, %405 : vector<1x288xf32>
    %409 = arith.addf %396, %408 : vector<1x288xf32>
    %c30_84 = arith.constant 30 : index
    %410 = memref.load %arg0[%c30_84] : memref<81xf32, #tpu.memory_space<smem>>
    %411 = vector.broadcast %410 : f32 to vector<1x288xf32>
    %412 = arith.mulf %411, %405 : vector<1x288xf32>
    %413 = arith.addf %400, %412 : vector<1x288xf32>
    %c57_85 = arith.constant 57 : index
    %414 = memref.load %arg0[%c57_85] : memref<81xf32, #tpu.memory_space<smem>>
    %415 = vector.broadcast %414 : f32 to vector<1x288xf32>
    %416 = arith.mulf %415, %405 : vector<1x288xf32>
    %417 = arith.addf %404, %416 : vector<1x288xf32>
    %c3_86 = arith.constant 3 : index
    %c19_87 = arith.constant 19 : index
    %418 = vector.load %arg2[%c3_86, %c19_87] : memref<6x342xf32, #tpu.memory_space<vmem>>, vector<1x288xf32>
    %c4_88 = arith.constant 4 : index
    %419 = memref.load %arg0[%c4_88] : memref<81xf32, #tpu.memory_space<smem>>
    %420 = vector.broadcast %419 : f32 to vector<1x288xf32>
    %421 = arith.mulf %420, %418 : vector<1x288xf32>
    %422 = arith.addf %409, %421 : vector<1x288xf32>
    %c31_89 = arith.constant 31 : index
    %423 = memref.load %arg0[%c31_89] : memref<81xf32, #tpu.memory_space<smem>>
    %424 = vector.broadcast %423 : f32 to vector<1x288xf32>
    %425 = arith.mulf %424, %418 : vector<1x288xf32>
    %426 = arith.addf %413, %425 : vector<1x288xf32>
    %c58_90 = arith.constant 58 : index
    %427 = memref.load %arg0[%c58_90] : memref<81xf32, #tpu.memory_space<smem>>
    %428 = vector.broadcast %427 : f32 to vector<1x288xf32>
    %429 = arith.mulf %428, %418 : vector<1x288xf32>
    %430 = arith.addf %417, %429 : vector<1x288xf32>
    %c3_91 = arith.constant 3 : index
    %c20_92 = arith.constant 20 : index
    %431 = vector.load %arg2[%c3_91, %c20_92] : memref<6x342xf32, #tpu.memory_space<vmem>>, vector<1x288xf32>
    %c5_93 = arith.constant 5 : index
    %432 = memref.load %arg0[%c5_93] : memref<81xf32, #tpu.memory_space<smem>>
    %433 = vector.broadcast %432 : f32 to vector<1x288xf32>
    %434 = arith.mulf %433, %431 : vector<1x288xf32>
    %435 = arith.addf %422, %434 : vector<1x288xf32>
    %c32_94 = arith.constant 32 : index
    %436 = memref.load %arg0[%c32_94] : memref<81xf32, #tpu.memory_space<smem>>
    %437 = vector.broadcast %436 : f32 to vector<1x288xf32>
    %438 = arith.mulf %437, %431 : vector<1x288xf32>
    %439 = arith.addf %426, %438 : vector<1x288xf32>
    %c59_95 = arith.constant 59 : index
    %440 = memref.load %arg0[%c59_95] : memref<81xf32, #tpu.memory_space<smem>>
    %441 = vector.broadcast %440 : f32 to vector<1x288xf32>
    %442 = arith.mulf %441, %431 : vector<1x288xf32>
    %443 = arith.addf %430, %442 : vector<1x288xf32>
    %c3_96 = arith.constant 3 : index
    %c36_97 = arith.constant 36 : index
    %444 = vector.load %arg2[%c3_96, %c36_97] : memref<6x342xf32, #tpu.memory_space<vmem>>, vector<1x288xf32>
    %c6_98 = arith.constant 6 : index
    %445 = memref.load %arg0[%c6_98] : memref<81xf32, #tpu.memory_space<smem>>
    %446 = vector.broadcast %445 : f32 to vector<1x288xf32>
    %447 = arith.mulf %446, %444 : vector<1x288xf32>
    %448 = arith.addf %435, %447 : vector<1x288xf32>
    %c33_99 = arith.constant 33 : index
    %449 = memref.load %arg0[%c33_99] : memref<81xf32, #tpu.memory_space<smem>>
    %450 = vector.broadcast %449 : f32 to vector<1x288xf32>
    %451 = arith.mulf %450, %444 : vector<1x288xf32>
    %452 = arith.addf %439, %451 : vector<1x288xf32>
    %c60_100 = arith.constant 60 : index
    %453 = memref.load %arg0[%c60_100] : memref<81xf32, #tpu.memory_space<smem>>
    %454 = vector.broadcast %453 : f32 to vector<1x288xf32>
    %455 = arith.mulf %454, %444 : vector<1x288xf32>
    %456 = arith.addf %443, %455 : vector<1x288xf32>
    %c3_101 = arith.constant 3 : index
    %c37_102 = arith.constant 37 : index
    %457 = vector.load %arg2[%c3_101, %c37_102] : memref<6x342xf32, #tpu.memory_space<vmem>>, vector<1x288xf32>
    %c7_103 = arith.constant 7 : index
    %458 = memref.load %arg0[%c7_103] : memref<81xf32, #tpu.memory_space<smem>>
    %459 = vector.broadcast %458 : f32 to vector<1x288xf32>
    %460 = arith.mulf %459, %457 : vector<1x288xf32>
    %461 = arith.addf %448, %460 : vector<1x288xf32>
    %c34_104 = arith.constant 34 : index
    %462 = memref.load %arg0[%c34_104] : memref<81xf32, #tpu.memory_space<smem>>
    %463 = vector.broadcast %462 : f32 to vector<1x288xf32>
    %464 = arith.mulf %463, %457 : vector<1x288xf32>
    %465 = arith.addf %452, %464 : vector<1x288xf32>
    %c61_105 = arith.constant 61 : index
    %466 = memref.load %arg0[%c61_105] : memref<81xf32, #tpu.memory_space<smem>>
    %467 = vector.broadcast %466 : f32 to vector<1x288xf32>
    %468 = arith.mulf %467, %457 : vector<1x288xf32>
    %469 = arith.addf %456, %468 : vector<1x288xf32>
    %c3_106 = arith.constant 3 : index
    %c38_107 = arith.constant 38 : index
    %470 = vector.load %arg2[%c3_106, %c38_107] : memref<6x342xf32, #tpu.memory_space<vmem>>, vector<1x288xf32>
    %c8_108 = arith.constant 8 : index
    %471 = memref.load %arg0[%c8_108] : memref<81xf32, #tpu.memory_space<smem>>
    %472 = vector.broadcast %471 : f32 to vector<1x288xf32>
    %473 = arith.mulf %472, %470 : vector<1x288xf32>
    %474 = arith.addf %461, %473 : vector<1x288xf32>
    %c35_109 = arith.constant 35 : index
    %475 = memref.load %arg0[%c35_109] : memref<81xf32, #tpu.memory_space<smem>>
    %476 = vector.broadcast %475 : f32 to vector<1x288xf32>
    %477 = arith.mulf %476, %470 : vector<1x288xf32>
    %478 = arith.addf %465, %477 : vector<1x288xf32>
    %c62_110 = arith.constant 62 : index
    %479 = memref.load %arg0[%c62_110] : memref<81xf32, #tpu.memory_space<smem>>
    %480 = vector.broadcast %479 : f32 to vector<1x288xf32>
    %481 = arith.mulf %480, %470 : vector<1x288xf32>
    %482 = arith.addf %469, %481 : vector<1x288xf32>
    %c4_111 = arith.constant 4 : index
    %c0_112 = arith.constant 0 : index
    %483 = vector.load %arg2[%c4_111, %c0_112] : memref<6x342xf32, #tpu.memory_space<vmem>>, vector<1x288xf32>
    %c9_113 = arith.constant 9 : index
    %484 = memref.load %arg0[%c9_113] : memref<81xf32, #tpu.memory_space<smem>>
    %485 = vector.broadcast %484 : f32 to vector<1x288xf32>
    %486 = arith.mulf %485, %483 : vector<1x288xf32>
    %487 = arith.addf %474, %486 : vector<1x288xf32>
    %c36_114 = arith.constant 36 : index
    %488 = memref.load %arg0[%c36_114] : memref<81xf32, #tpu.memory_space<smem>>
    %489 = vector.broadcast %488 : f32 to vector<1x288xf32>
    %490 = arith.mulf %489, %483 : vector<1x288xf32>
    %491 = arith.addf %478, %490 : vector<1x288xf32>
    %c63_115 = arith.constant 63 : index
    %492 = memref.load %arg0[%c63_115] : memref<81xf32, #tpu.memory_space<smem>>
    %493 = vector.broadcast %492 : f32 to vector<1x288xf32>
    %494 = arith.mulf %493, %483 : vector<1x288xf32>
    %495 = arith.addf %482, %494 : vector<1x288xf32>
    %c4_116 = arith.constant 4 : index
    %c1_117 = arith.constant 1 : index
    %496 = vector.load %arg2[%c4_116, %c1_117] : memref<6x342xf32, #tpu.memory_space<vmem>>, vector<1x288xf32>
    %c10_118 = arith.constant 10 : index
    %497 = memref.load %arg0[%c10_118] : memref<81xf32, #tpu.memory_space<smem>>
    %498 = vector.broadcast %497 : f32 to vector<1x288xf32>
    %499 = arith.mulf %498, %496 : vector<1x288xf32>
    %500 = arith.addf %487, %499 : vector<1x288xf32>
    %c37_119 = arith.constant 37 : index
    %501 = memref.load %arg0[%c37_119] : memref<81xf32, #tpu.memory_space<smem>>
    %502 = vector.broadcast %501 : f32 to vector<1x288xf32>
    %503 = arith.mulf %502, %496 : vector<1x288xf32>
    %504 = arith.addf %491, %503 : vector<1x288xf32>
    %c64_120 = arith.constant 64 : index
    %505 = memref.load %arg0[%c64_120] : memref<81xf32, #tpu.memory_space<smem>>
    %506 = vector.broadcast %505 : f32 to vector<1x288xf32>
    %507 = arith.mulf %506, %496 : vector<1x288xf32>
    %508 = arith.addf %495, %507 : vector<1x288xf32>
    %c4_121 = arith.constant 4 : index
    %c2_122 = arith.constant 2 : index
    %509 = vector.load %arg2[%c4_121, %c2_122] : memref<6x342xf32, #tpu.memory_space<vmem>>, vector<1x288xf32>
    %c11_123 = arith.constant 11 : index
    %510 = memref.load %arg0[%c11_123] : memref<81xf32, #tpu.memory_space<smem>>
    %511 = vector.broadcast %510 : f32 to vector<1x288xf32>
    %512 = arith.mulf %511, %509 : vector<1x288xf32>
    %513 = arith.addf %500, %512 : vector<1x288xf32>
    %c38_124 = arith.constant 38 : index
    %514 = memref.load %arg0[%c38_124] : memref<81xf32, #tpu.memory_space<smem>>
    %515 = vector.broadcast %514 : f32 to vector<1x288xf32>
    %516 = arith.mulf %515, %509 : vector<1x288xf32>
    %517 = arith.addf %504, %516 : vector<1x288xf32>
    %c65_125 = arith.constant 65 : index
    %518 = memref.load %arg0[%c65_125] : memref<81xf32, #tpu.memory_space<smem>>
    %519 = vector.broadcast %518 : f32 to vector<1x288xf32>
    %520 = arith.mulf %519, %509 : vector<1x288xf32>
    %521 = arith.addf %508, %520 : vector<1x288xf32>
    %c4_126 = arith.constant 4 : index
    %c18_127 = arith.constant 18 : index
    %522 = vector.load %arg2[%c4_126, %c18_127] : memref<6x342xf32, #tpu.memory_space<vmem>>, vector<1x288xf32>
    %c12_128 = arith.constant 12 : index
    %523 = memref.load %arg0[%c12_128] : memref<81xf32, #tpu.memory_space<smem>>
    %524 = vector.broadcast %523 : f32 to vector<1x288xf32>
    %525 = arith.mulf %524, %522 : vector<1x288xf32>
    %526 = arith.addf %513, %525 : vector<1x288xf32>
    %c39_129 = arith.constant 39 : index
    %527 = memref.load %arg0[%c39_129] : memref<81xf32, #tpu.memory_space<smem>>
    %528 = vector.broadcast %527 : f32 to vector<1x288xf32>
    %529 = arith.mulf %528, %522 : vector<1x288xf32>
    %530 = arith.addf %517, %529 : vector<1x288xf32>
    %c66_130 = arith.constant 66 : index
    %531 = memref.load %arg0[%c66_130] : memref<81xf32, #tpu.memory_space<smem>>
    %532 = vector.broadcast %531 : f32 to vector<1x288xf32>
    %533 = arith.mulf %532, %522 : vector<1x288xf32>
    %534 = arith.addf %521, %533 : vector<1x288xf32>
    %c4_131 = arith.constant 4 : index
    %c19_132 = arith.constant 19 : index
    %535 = vector.load %arg2[%c4_131, %c19_132] : memref<6x342xf32, #tpu.memory_space<vmem>>, vector<1x288xf32>
    %c13_133 = arith.constant 13 : index
    %536 = memref.load %arg0[%c13_133] : memref<81xf32, #tpu.memory_space<smem>>
    %537 = vector.broadcast %536 : f32 to vector<1x288xf32>
    %538 = arith.mulf %537, %535 : vector<1x288xf32>
    %539 = arith.addf %526, %538 : vector<1x288xf32>
    %c40_134 = arith.constant 40 : index
    %540 = memref.load %arg0[%c40_134] : memref<81xf32, #tpu.memory_space<smem>>
    %541 = vector.broadcast %540 : f32 to vector<1x288xf32>
    %542 = arith.mulf %541, %535 : vector<1x288xf32>
    %543 = arith.addf %530, %542 : vector<1x288xf32>
    %c67_135 = arith.constant 67 : index
    %544 = memref.load %arg0[%c67_135] : memref<81xf32, #tpu.memory_space<smem>>
    %545 = vector.broadcast %544 : f32 to vector<1x288xf32>
    %546 = arith.mulf %545, %535 : vector<1x288xf32>
    %547 = arith.addf %534, %546 : vector<1x288xf32>
    %c4_136 = arith.constant 4 : index
    %c20_137 = arith.constant 20 : index
    %548 = vector.load %arg2[%c4_136, %c20_137] : memref<6x342xf32, #tpu.memory_space<vmem>>, vector<1x288xf32>
    %c14_138 = arith.constant 14 : index
    %549 = memref.load %arg0[%c14_138] : memref<81xf32, #tpu.memory_space<smem>>
    %550 = vector.broadcast %549 : f32 to vector<1x288xf32>
    %551 = arith.mulf %550, %548 : vector<1x288xf32>
    %552 = arith.addf %539, %551 : vector<1x288xf32>
    %c41_139 = arith.constant 41 : index
    %553 = memref.load %arg0[%c41_139] : memref<81xf32, #tpu.memory_space<smem>>
    %554 = vector.broadcast %553 : f32 to vector<1x288xf32>
    %555 = arith.mulf %554, %548 : vector<1x288xf32>
    %556 = arith.addf %543, %555 : vector<1x288xf32>
    %c68_140 = arith.constant 68 : index
    %557 = memref.load %arg0[%c68_140] : memref<81xf32, #tpu.memory_space<smem>>
    %558 = vector.broadcast %557 : f32 to vector<1x288xf32>
    %559 = arith.mulf %558, %548 : vector<1x288xf32>
    %560 = arith.addf %547, %559 : vector<1x288xf32>
    %c4_141 = arith.constant 4 : index
    %c36_142 = arith.constant 36 : index
    %561 = vector.load %arg2[%c4_141, %c36_142] : memref<6x342xf32, #tpu.memory_space<vmem>>, vector<1x288xf32>
    %c15_143 = arith.constant 15 : index
    %562 = memref.load %arg0[%c15_143] : memref<81xf32, #tpu.memory_space<smem>>
    %563 = vector.broadcast %562 : f32 to vector<1x288xf32>
    %564 = arith.mulf %563, %561 : vector<1x288xf32>
    %565 = arith.addf %552, %564 : vector<1x288xf32>
    %c42_144 = arith.constant 42 : index
    %566 = memref.load %arg0[%c42_144] : memref<81xf32, #tpu.memory_space<smem>>
    %567 = vector.broadcast %566 : f32 to vector<1x288xf32>
    %568 = arith.mulf %567, %561 : vector<1x288xf32>
    %569 = arith.addf %556, %568 : vector<1x288xf32>
    %c69_145 = arith.constant 69 : index
    %570 = memref.load %arg0[%c69_145] : memref<81xf32, #tpu.memory_space<smem>>
    %571 = vector.broadcast %570 : f32 to vector<1x288xf32>
    %572 = arith.mulf %571, %561 : vector<1x288xf32>
    %573 = arith.addf %560, %572 : vector<1x288xf32>
    %c4_146 = arith.constant 4 : index
    %c37_147 = arith.constant 37 : index
    %574 = vector.load %arg2[%c4_146, %c37_147] : memref<6x342xf32, #tpu.memory_space<vmem>>, vector<1x288xf32>
    %c16_148 = arith.constant 16 : index
    %575 = memref.load %arg0[%c16_148] : memref<81xf32, #tpu.memory_space<smem>>
    %576 = vector.broadcast %575 : f32 to vector<1x288xf32>
    %577 = arith.mulf %576, %574 : vector<1x288xf32>
    %578 = arith.addf %565, %577 : vector<1x288xf32>
    %c43_149 = arith.constant 43 : index
    %579 = memref.load %arg0[%c43_149] : memref<81xf32, #tpu.memory_space<smem>>
    %580 = vector.broadcast %579 : f32 to vector<1x288xf32>
    %581 = arith.mulf %580, %574 : vector<1x288xf32>
    %582 = arith.addf %569, %581 : vector<1x288xf32>
    %c70_150 = arith.constant 70 : index
    %583 = memref.load %arg0[%c70_150] : memref<81xf32, #tpu.memory_space<smem>>
    %584 = vector.broadcast %583 : f32 to vector<1x288xf32>
    %585 = arith.mulf %584, %574 : vector<1x288xf32>
    %586 = arith.addf %573, %585 : vector<1x288xf32>
    %c4_151 = arith.constant 4 : index
    %c38_152 = arith.constant 38 : index
    %587 = vector.load %arg2[%c4_151, %c38_152] : memref<6x342xf32, #tpu.memory_space<vmem>>, vector<1x288xf32>
    %c17_153 = arith.constant 17 : index
    %588 = memref.load %arg0[%c17_153] : memref<81xf32, #tpu.memory_space<smem>>
    %589 = vector.broadcast %588 : f32 to vector<1x288xf32>
    %590 = arith.mulf %589, %587 : vector<1x288xf32>
    %591 = arith.addf %578, %590 : vector<1x288xf32>
    %c44_154 = arith.constant 44 : index
    %592 = memref.load %arg0[%c44_154] : memref<81xf32, #tpu.memory_space<smem>>
    %593 = vector.broadcast %592 : f32 to vector<1x288xf32>
    %594 = arith.mulf %593, %587 : vector<1x288xf32>
    %595 = arith.addf %582, %594 : vector<1x288xf32>
    %c71_155 = arith.constant 71 : index
    %596 = memref.load %arg0[%c71_155] : memref<81xf32, #tpu.memory_space<smem>>
    %597 = vector.broadcast %596 : f32 to vector<1x288xf32>
    %598 = arith.mulf %597, %587 : vector<1x288xf32>
    %599 = arith.addf %586, %598 : vector<1x288xf32>
    %c5_156 = arith.constant 5 : index
    %c0_157 = arith.constant 0 : index
    %600 = vector.load %arg2[%c5_156, %c0_157] : memref<6x342xf32, #tpu.memory_space<vmem>>, vector<1x288xf32>
    %c18_158 = arith.constant 18 : index
    %601 = memref.load %arg0[%c18_158] : memref<81xf32, #tpu.memory_space<smem>>
    %602 = vector.broadcast %601 : f32 to vector<1x288xf32>
    %603 = arith.mulf %602, %600 : vector<1x288xf32>
    %604 = arith.addf %591, %603 : vector<1x288xf32>
    %c45_159 = arith.constant 45 : index
    %605 = memref.load %arg0[%c45_159] : memref<81xf32, #tpu.memory_space<smem>>
    %606 = vector.broadcast %605 : f32 to vector<1x288xf32>
    %607 = arith.mulf %606, %600 : vector<1x288xf32>
    %608 = arith.addf %595, %607 : vector<1x288xf32>
    %c72_160 = arith.constant 72 : index
    %609 = memref.load %arg0[%c72_160] : memref<81xf32, #tpu.memory_space<smem>>
    %610 = vector.broadcast %609 : f32 to vector<1x288xf32>
    %611 = arith.mulf %610, %600 : vector<1x288xf32>
    %612 = arith.addf %599, %611 : vector<1x288xf32>
    %c5_161 = arith.constant 5 : index
    %c1_162 = arith.constant 1 : index
    %613 = vector.load %arg2[%c5_161, %c1_162] : memref<6x342xf32, #tpu.memory_space<vmem>>, vector<1x288xf32>
    %c19_163 = arith.constant 19 : index
    %614 = memref.load %arg0[%c19_163] : memref<81xf32, #tpu.memory_space<smem>>
    %615 = vector.broadcast %614 : f32 to vector<1x288xf32>
    %616 = arith.mulf %615, %613 : vector<1x288xf32>
    %617 = arith.addf %604, %616 : vector<1x288xf32>
    %c46_164 = arith.constant 46 : index
    %618 = memref.load %arg0[%c46_164] : memref<81xf32, #tpu.memory_space<smem>>
    %619 = vector.broadcast %618 : f32 to vector<1x288xf32>
    %620 = arith.mulf %619, %613 : vector<1x288xf32>
    %621 = arith.addf %608, %620 : vector<1x288xf32>
    %c73_165 = arith.constant 73 : index
    %622 = memref.load %arg0[%c73_165] : memref<81xf32, #tpu.memory_space<smem>>
    %623 = vector.broadcast %622 : f32 to vector<1x288xf32>
    %624 = arith.mulf %623, %613 : vector<1x288xf32>
    %625 = arith.addf %612, %624 : vector<1x288xf32>
    %c5_166 = arith.constant 5 : index
    %c2_167 = arith.constant 2 : index
    %626 = vector.load %arg2[%c5_166, %c2_167] : memref<6x342xf32, #tpu.memory_space<vmem>>, vector<1x288xf32>
    %c20_168 = arith.constant 20 : index
    %627 = memref.load %arg0[%c20_168] : memref<81xf32, #tpu.memory_space<smem>>
    %628 = vector.broadcast %627 : f32 to vector<1x288xf32>
    %629 = arith.mulf %628, %626 : vector<1x288xf32>
    %630 = arith.addf %617, %629 : vector<1x288xf32>
    %c47_169 = arith.constant 47 : index
    %631 = memref.load %arg0[%c47_169] : memref<81xf32, #tpu.memory_space<smem>>
    %632 = vector.broadcast %631 : f32 to vector<1x288xf32>
    %633 = arith.mulf %632, %626 : vector<1x288xf32>
    %634 = arith.addf %621, %633 : vector<1x288xf32>
    %c74_170 = arith.constant 74 : index
    %635 = memref.load %arg0[%c74_170] : memref<81xf32, #tpu.memory_space<smem>>
    %636 = vector.broadcast %635 : f32 to vector<1x288xf32>
    %637 = arith.mulf %636, %626 : vector<1x288xf32>
    %638 = arith.addf %625, %637 : vector<1x288xf32>
    %c5_171 = arith.constant 5 : index
    %c18_172 = arith.constant 18 : index
    %639 = vector.load %arg2[%c5_171, %c18_172] : memref<6x342xf32, #tpu.memory_space<vmem>>, vector<1x288xf32>
    %c21_173 = arith.constant 21 : index
    %640 = memref.load %arg0[%c21_173] : memref<81xf32, #tpu.memory_space<smem>>
    %641 = vector.broadcast %640 : f32 to vector<1x288xf32>
    %642 = arith.mulf %641, %639 : vector<1x288xf32>
    %643 = arith.addf %630, %642 : vector<1x288xf32>
    %c48_174 = arith.constant 48 : index
    %644 = memref.load %arg0[%c48_174] : memref<81xf32, #tpu.memory_space<smem>>
    %645 = vector.broadcast %644 : f32 to vector<1x288xf32>
    %646 = arith.mulf %645, %639 : vector<1x288xf32>
    %647 = arith.addf %634, %646 : vector<1x288xf32>
    %c75_175 = arith.constant 75 : index
    %648 = memref.load %arg0[%c75_175] : memref<81xf32, #tpu.memory_space<smem>>
    %649 = vector.broadcast %648 : f32 to vector<1x288xf32>
    %650 = arith.mulf %649, %639 : vector<1x288xf32>
    %651 = arith.addf %638, %650 : vector<1x288xf32>
    %c5_176 = arith.constant 5 : index
    %c19_177 = arith.constant 19 : index
    %652 = vector.load %arg2[%c5_176, %c19_177] : memref<6x342xf32, #tpu.memory_space<vmem>>, vector<1x288xf32>
    %c22_178 = arith.constant 22 : index
    %653 = memref.load %arg0[%c22_178] : memref<81xf32, #tpu.memory_space<smem>>
    %654 = vector.broadcast %653 : f32 to vector<1x288xf32>
    %655 = arith.mulf %654, %652 : vector<1x288xf32>
    %656 = arith.addf %643, %655 : vector<1x288xf32>
    %c49_179 = arith.constant 49 : index
    %657 = memref.load %arg0[%c49_179] : memref<81xf32, #tpu.memory_space<smem>>
    %658 = vector.broadcast %657 : f32 to vector<1x288xf32>
    %659 = arith.mulf %658, %652 : vector<1x288xf32>
    %660 = arith.addf %647, %659 : vector<1x288xf32>
    %c76_180 = arith.constant 76 : index
    %661 = memref.load %arg0[%c76_180] : memref<81xf32, #tpu.memory_space<smem>>
    %662 = vector.broadcast %661 : f32 to vector<1x288xf32>
    %663 = arith.mulf %662, %652 : vector<1x288xf32>
    %664 = arith.addf %651, %663 : vector<1x288xf32>
    %c5_181 = arith.constant 5 : index
    %c20_182 = arith.constant 20 : index
    %665 = vector.load %arg2[%c5_181, %c20_182] : memref<6x342xf32, #tpu.memory_space<vmem>>, vector<1x288xf32>
    %c23_183 = arith.constant 23 : index
    %666 = memref.load %arg0[%c23_183] : memref<81xf32, #tpu.memory_space<smem>>
    %667 = vector.broadcast %666 : f32 to vector<1x288xf32>
    %668 = arith.mulf %667, %665 : vector<1x288xf32>
    %669 = arith.addf %656, %668 : vector<1x288xf32>
    %c50_184 = arith.constant 50 : index
    %670 = memref.load %arg0[%c50_184] : memref<81xf32, #tpu.memory_space<smem>>
    %671 = vector.broadcast %670 : f32 to vector<1x288xf32>
    %672 = arith.mulf %671, %665 : vector<1x288xf32>
    %673 = arith.addf %660, %672 : vector<1x288xf32>
    %c77_185 = arith.constant 77 : index
    %674 = memref.load %arg0[%c77_185] : memref<81xf32, #tpu.memory_space<smem>>
    %675 = vector.broadcast %674 : f32 to vector<1x288xf32>
    %676 = arith.mulf %675, %665 : vector<1x288xf32>
    %677 = arith.addf %664, %676 : vector<1x288xf32>
    %c5_186 = arith.constant 5 : index
    %c36_187 = arith.constant 36 : index
    %678 = vector.load %arg2[%c5_186, %c36_187] : memref<6x342xf32, #tpu.memory_space<vmem>>, vector<1x288xf32>
    %c24_188 = arith.constant 24 : index
    %679 = memref.load %arg0[%c24_188] : memref<81xf32, #tpu.memory_space<smem>>
    %680 = vector.broadcast %679 : f32 to vector<1x288xf32>
    %681 = arith.mulf %680, %678 : vector<1x288xf32>
    %682 = arith.addf %669, %681 : vector<1x288xf32>
    %c51_189 = arith.constant 51 : index
    %683 = memref.load %arg0[%c51_189] : memref<81xf32, #tpu.memory_space<smem>>
    %684 = vector.broadcast %683 : f32 to vector<1x288xf32>
    %685 = arith.mulf %684, %678 : vector<1x288xf32>
    %686 = arith.addf %673, %685 : vector<1x288xf32>
    %c78_190 = arith.constant 78 : index
    %687 = memref.load %arg0[%c78_190] : memref<81xf32, #tpu.memory_space<smem>>
    %688 = vector.broadcast %687 : f32 to vector<1x288xf32>
    %689 = arith.mulf %688, %678 : vector<1x288xf32>
    %690 = arith.addf %677, %689 : vector<1x288xf32>
    %c5_191 = arith.constant 5 : index
    %c37_192 = arith.constant 37 : index
    %691 = vector.load %arg2[%c5_191, %c37_192] : memref<6x342xf32, #tpu.memory_space<vmem>>, vector<1x288xf32>
    %c25_193 = arith.constant 25 : index
    %692 = memref.load %arg0[%c25_193] : memref<81xf32, #tpu.memory_space<smem>>
    %693 = vector.broadcast %692 : f32 to vector<1x288xf32>
    %694 = arith.mulf %693, %691 : vector<1x288xf32>
    %695 = arith.addf %682, %694 : vector<1x288xf32>
    %c52_194 = arith.constant 52 : index
    %696 = memref.load %arg0[%c52_194] : memref<81xf32, #tpu.memory_space<smem>>
    %697 = vector.broadcast %696 : f32 to vector<1x288xf32>
    %698 = arith.mulf %697, %691 : vector<1x288xf32>
    %699 = arith.addf %686, %698 : vector<1x288xf32>
    %c79_195 = arith.constant 79 : index
    %700 = memref.load %arg0[%c79_195] : memref<81xf32, #tpu.memory_space<smem>>
    %701 = vector.broadcast %700 : f32 to vector<1x288xf32>
    %702 = arith.mulf %701, %691 : vector<1x288xf32>
    %703 = arith.addf %690, %702 : vector<1x288xf32>
    %c5_196 = arith.constant 5 : index
    %c38_197 = arith.constant 38 : index
    %704 = vector.load %arg2[%c5_196, %c38_197] : memref<6x342xf32, #tpu.memory_space<vmem>>, vector<1x288xf32>
    %c26_198 = arith.constant 26 : index
    %705 = memref.load %arg0[%c26_198] : memref<81xf32, #tpu.memory_space<smem>>
    %706 = vector.broadcast %705 : f32 to vector<1x288xf32>
    %707 = arith.mulf %706, %704 : vector<1x288xf32>
    %708 = arith.addf %695, %707 : vector<1x288xf32>
    %c53_199 = arith.constant 53 : index
    %709 = memref.load %arg0[%c53_199] : memref<81xf32, #tpu.memory_space<smem>>
    %710 = vector.broadcast %709 : f32 to vector<1x288xf32>
    %711 = arith.mulf %710, %704 : vector<1x288xf32>
    %712 = arith.addf %699, %711 : vector<1x288xf32>
    %c80_200 = arith.constant 80 : index
    %713 = memref.load %arg0[%c80_200] : memref<81xf32, #tpu.memory_space<smem>>
    %714 = vector.broadcast %713 : f32 to vector<1x288xf32>
    %715 = arith.mulf %714, %704 : vector<1x288xf32>
    %716 = arith.addf %703, %715 : vector<1x288xf32>
    %c3_201 = arith.constant 3 : index
    %c0_202 = arith.constant 0 : index
    %717 = vector.load %arg3[%c3_201, %c0_202] : memref<6x288xf32, #tpu.memory_space<vmem>>, vector<1x288xf32>
    tpu.vector_store %arg3[%c3_201, %c0_202], %708 {strides = array<i32>} : memref<6x288xf32, #tpu.memory_space<vmem>>, vector<1x288xf32>,
    %c4_203 = arith.constant 4 : index
    %c0_204 = arith.constant 0 : index
    %718 = vector.load %arg3[%c4_203, %c0_204] : memref<6x288xf32, #tpu.memory_space<vmem>>, vector<1x288xf32>
    tpu.vector_store %arg3[%c4_203, %c0_204], %712 {strides = array<i32>} : memref<6x288xf32, #tpu.memory_space<vmem>>, vector<1x288xf32>,
    %c5_205 = arith.constant 5 : index
    %c0_206 = arith.constant 0 : index
    %719 = vector.load %arg3[%c5_205, %c0_206] : memref<6x288xf32, #tpu.memory_space<vmem>>, vector<1x288xf32>
    tpu.vector_store %arg3[%c5_205, %c0_206], %716 {strides = array<i32>} : memref<6x288xf32, #tpu.memory_space<vmem>>, vector<1x288xf32>,
    return
  }
}

</mosaic_0001>

<bundles_post_ra>
// kernel: tpu_custom_call.1
= control target key start
LH: loop header
LB: loop body
LE: loop exit
PB: predicated region body
PF: predicated region fallthrough
CT: control target
= control target key end

     0   :  { %s3135_s0 = inlined_call_operand.hbm [shape: f32[81], index: 0, kind: input, shape index: {}]   ;;  %s3136_s1 = inlined_call_operand.vmem [shape: f32[3], index: 1, kind: input, shape index: {}]   ;;  %s3137_s2 = inlined_call_operand.hbm [shape: f32[6,342], index: 2, kind: input, shape index: {}]   ;;  %s3138_s3 = inlined_call_operand.hbm [shape: f32[6,288], index: 3, kind: output, shape index: {}]  }
   0x1   :  { %3173 = sst [smem:[#allocation30_spill]] %s3138_s3 }
   0x2   :  { %8 = vsyncpa [#allocation5], 0 }
   0x3   :  { %9 = vsyncpa [#allocation6], 0 }
   0x4   :  { %10 = vsyncpa [#allocation3], 0 }
   0x5   :  { %11 = vsyncpa [#allocation4], 0  ;;  %s26_s14 = sshll.u32 %s3136_s1, 4  ;;  %s1877_s15 = smov [#allocation2]   ;;  %s27_s14 = int_to_ptr.vmem [resolvable:$true] %s26_s14 }
   0x6   :  { %19 = dma.hbm_to_smem %s3135_s0, 16, %s1877_s15, [#allocation5]  }
   0x7   :  { %s1817_s18 = scalar_lea.vmem %s27_s14, 16  ;;  %p1822_p1 = scmp.lt.s32.totalorder %s27_s14, %s27_s14 }
   0x8   :  { %p1818_p0 = scmp.ne.s32.totalorder %s27_s14, %s1817_s18  ;;  %p1823_p2 = scmp.lt.s32.totalorder %s1817_s18, %s1817_s18 }
   0xa   :  { %p1824_p3 = por %p1823_p2, %p1822_p1 }
   0xc   :  { %p1825_p4 = pnand %p1824_p3, %p1818_p0 }
   0xe   :  { %1828 = shalt.err (!%p1825_p4)
}
   0xf   :  { %s1878_s19 = smov [#allocation7]   ;;  %s1879_s20 = smov [#allocation8]  }
  0x10   :  { %29 = dma.vmem_to_smem %s27_s14, 16, %s1878_s19, [#allocation6]  }
  0x11   :  { %s36_s21 = sshll.u32 %s1879_s20, 4  ;;  %s37_s21 = int_to_ptr.vmem [resolvable:$true] %s36_s21 }
  0x12   :  { %s1837_s22 = scalar_lea.vmem %s37_s21, 384  ;;  %p1842_p6 = scmp.lt.s32.totalorder %s37_s21, %s37_s21 }
  0x13   :  { %p1838_p5 = scmp.ne.s32.totalorder %s37_s21, %s1837_s22  ;;  %p1843_p7 = scmp.lt.s32.totalorder %s1837_s22, %s1837_s22 }
  0x15   :  { %p1844_p8 = por %p1843_p7, %p1842_p6 }
  0x17   :  { %p1845_p9 = pnand %p1844_p8, %p1838_p5 }
  0x19   :  { %1848 = shalt.err (!%p1845_p9)
}
  0x1a   :  { %39 = dma.hbm_to_vmem [thread:$0]  %s3137_s2, 384, %s37_s21, [#allocation3]  }
  0x1b   :  { %1869 = dma.done.wait [#allocation5], 16  }
  0x1c   :  { %1870 = vsyncadd [#allocation5], 4294967280 }
  0x1d   :  { %1871 = dma.done.wait [#allocation6], 16  }
  0x1e   :  { %1872 = vsyncadd [#allocation6], 4294967280 }
  0x1f   :  { %1873 = dma.done.wait [#allocation3], 384  }
  0x20   :  { %1874 = vsyncadd [#allocation3], 4294966912 }
  0x21   :  { %49 = sfence }
  0x22   :  { %s1918_s23 = sld [smem:[#allocation2 + $0x37]]  ;;  %v1926_v0 = vld [vmem:[#allocation8] ss:$8 sm:$0x7]  ;;  %s3149_s30 = smov 127   ;;  %vm76_vm0 = vcmask 1039360  }
  0x23   :  { %s1920_s24 = sld [smem:[#allocation2 + $0x1]]  ;;  %s3147_s6 = smov 126   ;;  %v2094_v49 = vld [vmem:[#allocation8 + $0x1] ss:$8 sm:$0x7]  ;;  %vm107_vm1 = vcmask 1031168  }
  0x24   :  { %s1922_s25 = sld [smem:[#allocation2 + $0x2]]  ;;  %s3143_s11 = smov 110   ;;  %vm138_vm2 = vcmask 900096   ;;  %vm169_vm3 = vcmask 891904   ;;  %vm200_vm4 = vcmask 883712   ;;  %vm231_vm5 = vcmask 752640  }
  0x25   :  { %s1924_s2 = sld [smem:[#allocation2 + $0x1c]]  ;;  %s3141_s14 = smov 109   ;;  %vm262_vm6 = vcmask 744448   ;;  %vm293_vm7 = vcmask 736256  }
  0x26   :  { %s1928_s26 = sld [smem:[#allocation2 + $0x38]]  ;;  %s3139_s19 = smov 108  }
  0x27   :  { %s1930_s27 = sld [smem:[#allocation2 + $0x1d]]  ;;  %s3145_s22 = smov 92  }
  0x28   :  { %v91_v1 = vstv %s1918_s23  ;;  %s1933_s28 = sld [smem:[#allocation2 + $0x1e]] }
  0x29   :  { %v92_v2 = vmul.f32 %v91_v1, %v1926_v0  ;;  %v70_v3 = vstv %s1920_s24  ;;  %s1939_s29 = sld [smem:[#allocation2 + $0x3]] }
  0x2a   :  { %v71_v4 = vmul.f32 %v70_v3, %v1926_v0  ;;  %v101_v5 = vstv %s1922_s25  ;;  %s1955_s4 = sld [smem:[#allocation2 + $0x4]] }
  0x2b   :  { %94 = vrot.lane.b32.xlu1 %v92_v2, %s3149_s30  ;;  %v102_v6 = vmul.f32 %v101_v5, %v1926_v0  ;;  %v81_v7 = vstv %s1924_s2  ;;  %s1958_s5 = sld [smem:[#allocation2 + $0x39]] }
  0x2c   :  { %73 = vrot.lane.b32.xlu0 %v71_v4, %s3149_s30  ;;  %v82_v8 = vmul.f32 %v81_v7, %v1926_v0  ;;  %v122_v9 = vstv %s1928_s26  ;;  %s1969_s7 = sld [smem:[#allocation2 + $0x3a]] }
  0x2d   :  { %v112_v10 = vstv %s1930_s27  ;;  %v123_v11 = vmul.f32 %v122_v9, %v1926_v0  ;;  %s1972_s8 = sld [smem:[#allocation2 + $0x1f]] }
  0x2e   :  { %v113_v12 = vmul.f32 %v112_v10, %v1926_v0  ;;  %v143_v13 = vstv %s1933_s28  ;;  %s1983_s9 = sld [smem:[#allocation2 + $0x20]] }
  0x2f   :  { %104 = vrot.lane.b32.xlu1 %v102_v6, %s3147_s6  ;;  %v132_v14 = vstv %s1939_s29  ;;  %v144_v15 = vmul.f32 %v143_v13, %v1926_v0  ;;  %s1986_s10 = sld [smem:[#allocation2 + $0x5]] }
  0x30   :  { %84 = vrot.lane.b32.xlu0 %v82_v8, %s3149_s30  ;;  %v133_v16 = vmul.f32 %v132_v14, %v1926_v0  ;;  %v163_v17 = vstv %s1955_s4  ;;  %s1997_s12 = sld [smem:[#allocation2 + $0x6]]  ;;  %s3156_s30 = smov 90  }
  0x31   :  { %v153_v18 = vstv %s1958_s5  ;;  %v164_v19 = vmul.f32 %v163_v17, %v1926_v0  ;;  %s2000_s13 = sld [smem:[#allocation2 + $0x3b]] }
  0x32   :  { %v154_v20 = vmul.f32 %v153_v18, %v1926_v0  ;;  %v184_v21 = vstv %s1969_s7  ;;  %s2011_s15 = sld [smem:[#allocation2 + $0x3c]] }
  0x33   :  { %125 = vrot.lane.b32.xlu1 %v123_v11, %s3147_s6  ;;  %v174_v22 = vstv %s1972_s8  ;;  %v185_v23 = vmul.f32 %v184_v21, %v1926_v0  ;;  %s2014_s16 = sld [smem:[#allocation2 + $0x21]] }
  0x34   :  { %115 = vrot.lane.b32.xlu0 %v113_v12, %s3147_s6  ;;  %v175_v24 = vmul.f32 %v174_v22, %v1926_v0  ;;  %v205_v25 = vstv %s1983_s9  ;;  %s2025_s17 = sld [smem:[#allocation2 + $0x22]] }
  0x35   :  { %v194_v26 = vstv %s1986_s10  ;;  %v206_v27 = vmul.f32 %v205_v25, %v1926_v0  ;;  %s2028_s18 = sld [smem:[#allocation2 + $0x7]] }
  0x36   :  { %3174 = sst [smem:[#allocation14_spill]] %s1997_s12  ;;  %v195_v28 = vmul.f32 %v194_v26, %v1926_v0  ;;  %v225_v29 = vstv %s1997_s12 }
  0x37   :  { %146 = vrot.lane.b32.xlu1 %v144_v15, %s3143_s11  ;;  %3175 = sst [smem:[#allocation15_spill]] %s2000_s13  ;;  %v215_v30 = vstv %s2000_s13  ;;  %v226_v31 = vmul.f32 %v225_v29, %v1926_v0  ;;  %s3197_s13 = smov 90  }
  0x38   :  { %135 = vrot.lane.b32.xlu0 %v133_v16, %s3143_s11  ;;  %3176 = sst [smem:[#allocation16_spill]] %s2011_s15  ;;  %v216_v32 = vmul.f32 %v215_v30, %v1926_v0  ;;  %v246_v33 = vstv %s2011_s15  ;;  %s3196_s15 = smov 91  }
  0x39   :  { %3177 = sst [smem:[#allocation17_spill]] %s2014_s16  ;;  %v236_v34 = vstv %s2014_s16  ;;  %v247_v35 = vmul.f32 %v246_v33, %v1926_v0  ;;  %s3195_s16 = smov 92  }
  0x3a   :  { %3178 = sst [smem:[#allocation18_spill]] %s2025_s17  ;;  %v237_v36 = vmul.f32 %v236_v34, %v1926_v0  ;;  %v267_v37 = vstv %s2025_s17  ;;  %s3194_s17 = smov 108  }
  0x3b   :  { %166 = vrot.lane.b32.xlu1 %v164_v19, %s3141_s14  ;;  %3179 = sst [smem:[#allocation19_spill]] %s2028_s18  ;;  %v256_v38 = vstv %s2028_s18  ;;  %v268_v39 = vmul.f32 %v267_v37, %v1926_v0  ;;  %s3192_s18 = smov 110  }
  0x3c   :  { %156 = vrot.lane.b32.xlu0 %v154_v20, %s3143_s11  ;;  %s2039_s20 = sld [smem:[#allocation2 + $0x8]]  ;;  %v257_v40 = vmul.f32 %v256_v38, %v1926_v0  ;;  %s3152_s11 = smov 91  }
  0x3d   :  { %s2042_s21 = sld [smem:[#allocation2 + $0x3d]] }
  0x3e   :  { %s2053_s0 = sld [smem:[#allocation2 + $0x3e]] }
  0x3f   :  { %187 = vrot.lane.b32.xlu1 %v185_v23, %s3141_s14  ;;  %s2056_s1 = sld [smem:[#allocation2 + $0x23]] }
  0x40   :  { %177 = vrot.lane.b32.xlu0 %v175_v24, %s3141_s14  ;;  %s2070_s14 = sld [smem:[#allocation2 + $0xa]] }
  0x41   :  { %s2084_s6 = sld [smem:[#allocation2 + $0x40]] }
  0x42   :  { %3180 = sst [smem:[#allocation20_spill]] %s2039_s20  ;;  %v287_v41 = vstv %s2039_s20 }
  0x43   :  { %208 = vrot.lane.b32.xlu1 %v206_v27, %s3139_s19  ;;  %3181 = sst [smem:[#allocation21_spill]] %s2042_s21  ;;  %v277_v42 = vstv %s2042_s21  ;;  %v288_v43 = vmul.f32 %v287_v41, %v1926_v0 }
  0x44   :  { %197 = vrot.lane.b32.xlu0 %v195_v28, %s3139_s19  ;;  %3182 = sst [smem:[#allocation22_spill]] %s2053_s0  ;;  %v278_v44 = vmul.f32 %v277_v42, %v1926_v0  ;;  %v308_v45 = vstv %s2053_s0  ;;  %s3190_s0 = smov 127  }
  0x45   :  { %3183 = sst [smem:[#allocation23_spill]] %s2056_s1  ;;  %v298_v46 = vstv %s2056_s1  ;;  %v309_v47 = vmul.f32 %v308_v45, %v1926_v0 }
  0x46   :  { %3185 = sst [smem:[#allocation25_spill]] %s2070_s14  ;;  %v299_v48 = vmul.f32 %v298_v46, %v1926_v0  ;;  %v332_v51 = vstv %s2070_s14 }
  0x47   :  { %228 = vrot.lane.b32.xlu1 %v226_v31, %s3145_s22  ;;  %3187 = sst [smem:[#allocation27_spill]] %s2084_s6  ;;  %v333_v53 = vmul.f32 %v332_v51, %v2094_v49  ;;  %v352_v55 = vstv %s2084_s6 }
  0x48   :  { %218 = vrot.lane.b32.xlu0 %v216_v32, %s3139_s19  ;;  %s2067_s19 = sld [smem:[#allocation2 + $0x25]]  ;;  %v353_v57 = vmul.f32 %v352_v55, %v2094_v49 }
  0x49   :  { %s2097_s3 = sld [smem:[#allocation2 + $0x41]] }
  0x4a   :  { %s2100_s21 = sld [smem:[#allocation2 + $0x26]] }
  0x4b   :  { %249 = vrot.lane.b32.xlu1 %v247_v35, %s3145_s22  ;;  %s1668_s1 = sld [smem:[#allocation2 + $0xc]] }
  0x4c   :  { %239 = vrot.lane.b32.xlu0 %v237_v36, %s3145_s22  ;;  %s2081_s22 = sld [smem:[#allocation2 + $0xb]] }
  0x4d   :  { %s1670_s14 = sld [smem:[#allocation2 + $0x42]] }
  0x4e   :  { %3184 = sst [smem:[#allocation24_spill]] %s2067_s19  ;;  %v342_v50 = vstv %s2067_s19  ;;  %s3191_s19 = smov 126  }
  0x4f   :  { %270 = vrot.lane.b32.xlu1 %v268_v39, %s3152_s11  ;;  %3188 = sst [smem:[#allocation28_spill]] %s2097_s3  ;;  %v343_v52 = vmul.f32 %v342_v50, %v2094_v49  ;;  %v3172_v58 = vstv %s2097_s3 }
  0x50   :  { %259 = vrot.lane.b32.xlu0 %v257_v40, %s3152_s11  ;;  %3189 = sst [smem:[#allocation29_spill]] %s2100_s21  ;;  %v3171_v59 = vstv %s2100_s21  ;;  %v383_v60 = vmul.f32 %v3172_v58, %v2094_v49  ;;  %s3193_s21 = smov 109  }
  0x51   :  { %v373_v61 = vmul.f32 %v3171_v59, %v2094_v49  ;;  %v392_v63 = vstv %s1668_s1  ;;  %s1672_s20 = sld [smem:[#allocation2 + $0x28]] }
  0x52   :  { %3186 = sst [smem:[#allocation26_spill]] %s2081_s22  ;;  %v362_v54 = vstv %s2081_s22  ;;  %v393_v4 = vmul.f32 %v392_v63, %v2094_v49 }
  0x53   :  { %290 = vrot.lane.b32.xlu1 %v288_v43, %s3156_s30  ;;  %v363_v56 = vmul.f32 %v362_v54, %v2094_v49  ;;  %s1673_s22 = sld [smem:[#allocation2 + $0x43]]  ;;  %v412_v8 = vstv %s1670_s14 }
  0x54   :  { %280 = vrot.lane.b32.xlu0 %v278_v44, %s3152_s11  ;;  %s1669_s11 = sld [smem:[#allocation2 + $0x27]]  ;;  %v413_v12 = vmul.f32 %v412_v8, %v2094_v49 }
  0x55   :  { %s1675_s3 = sld [smem:[#allocation2 + $0x29]] }
  0x56   :  { %s1674_s6 = sld [smem:[#allocation2 + $0xe]] }
  0x57   :  { %311 = vrot.lane.b32.xlu1 %v309_v47, %s3156_s30  ;;  %v432_v16 = vstv %s1672_s20  ;;  %s1676_s1 = sld [smem:[#allocation2 + $0x44]] }
  0x58   :  { %301 = vrot.lane.b32.xlu0 %v299_v48, %s3156_s30  ;;  %s1671_s30 = sld [smem:[#allocation2 + $0xd]]  ;;  %v433_v20 = vmul.f32 %v432_v16, %v2094_v49 }
  0x59   :  { %v442_v15 = vstv %s1673_s22  ;;  %s1678_s14 = sld [smem:[#allocation2 + $0x2a]] }
  0x5a   :  { %v402_v62 = vstv %s1669_s11  ;;  %s1677_s11 = sld [smem:[#allocation2 + $0xf]]  ;;  %v443_v19 = vmul.f32 %v442_v15, %v2094_v49 }
  0x5b   :  { %345 = vrot.lane.b32.xlu1 %v343_v52, %s3190_s0  ;;  %v403_v2 = vmul.f32 %v402_v62, %v2094_v49  ;;  %v462_v23 = vstv %s1675_s3  ;;  %s1681_s20 = sld [smem:[#allocation2 + $0x2b]] }
  0x5c   :  { %335 = vrot.lane.b32.xlu0 %v333_v53, %s3190_s0  ;;  %v452_v24 = vstv %s1674_s6  ;;  %v463_v27 = vmul.f32 %v462_v23, %v2094_v49  ;;  %s1680_s22 = sld [smem:[#allocation2 + $0x10]] }
  0x5d   :  { %v453_v28 = vmul.f32 %v452_v24, %v2094_v49  ;;  %v472_v32 = vstv %s1676_s1  ;;  %s1683_s3 = sld [smem:[#allocation2 + $0x11]] }
  0x5e   :  { %v422_v6 = vstv %s1671_s30  ;;  %s1679_s30 = sld [smem:[#allocation2 + $0x45]]  ;;  %v473_v36 = vmul.f32 %v472_v32, %v2094_v49 }
  0x5f   :  { %365 = vrot.lane.b32.xlu1 %v363_v56, %s3191_s19  ;;  %v423_v11 = vmul.f32 %v422_v6, %v2094_v49  ;;  %v492_v40 = vstv %s1678_s14  ;;  %s1682_s6 = sld [smem:[#allocation2 + $0x46]]  ;;  %v2166_v6 = vld [vmem:[#allocation8 + $0x2] ss:$8 sm:$0x7] }
  0x60   :  { %355 = vrot.lane.b32.xlu0 %v353_v57, %s3190_s0  ;;  %v482_v31 = vstv %s1677_s11  ;;  %v493_v44 = vmul.f32 %v492_v40, %v2094_v49  ;;  %s1685_s11 = sld [smem:[#allocation2 + $0x47]] }
  0x61   :  { %v483_v35 = vmul.f32 %v482_v31, %v2094_v49  ;;  %v522_v47 = vstv %s1681_s20  ;;  %s1684_s1 = sld [smem:[#allocation2 + $0x2c]] }
  0x62   :  { %v512_v48 = vstv %s1680_s22  ;;  %v523_v52 = vmul.f32 %v522_v47, %v2094_v49  ;;  %s1689_s14 = sld [smem:[#allocation2 + $0x13]] }
  0x63   :  { %385 = vrot.lane.b32.xlu1 %v383_v60, %s3191_s19  ;;  %v513_v53 = vmul.f32 %v512_v48, %v2094_v49  ;;  %v542_v56 = vstv %s1683_s3  ;;  %s1692_s20 = sld [smem:[#allocation2 + $0x14]] }
  0x64   :  { %375 = vrot.lane.b32.xlu0 %v373_v61, %s3191_s19  ;;  %v502_v39 = vstv %s1679_s30  ;;  %s1690_s30 = sld [smem:[#allocation2 + $0x2e]]  ;;  %v543_v60 = vmul.f32 %v542_v56, %v2094_v49 }
  0x65   :  { %v503_v43 = vmul.f32 %v502_v39, %v2094_v49  ;;  %v532_v57 = vstv %s1682_s6  ;;  %s1691_s22 = sld [smem:[#allocation2 + $0x49]] }
  0x66   :  { %v533_v61 = vmul.f32 %v532_v57, %v2094_v49  ;;  %v562_v62 = vstv %s1685_s11  ;;  %s1694_s3 = sld [smem:[#allocation2 + $0x4a]] }
  0x67   :  { %405 = vrot.lane.b32.xlu1 %v403_v2, %s3192_s18  ;;  %v552_v63 = vstv %s1684_s1  ;;  %v563_v2 = vmul.f32 %v562_v62, %v2094_v49  ;;  %s1693_s6 = sld [smem:[#allocation2 + $0x2f]] }
  0x68   :  { %395 = vrot.lane.b32.xlu0 %v393_v4, %s3192_s18  ;;  %v553_v4 = vmul.f32 %v552_v63, %v2094_v49  ;;  %s1696_s11 = sld [smem:[#allocation2 + $0x30]] }
  0x69   :  { %v616_v16 = vstv %s1692_s20  ;;  %s1695_s1 = sld [smem:[#allocation2 + $0x15]] }
  0x6a   :  { %v596_v8 = vstv %s1690_s30  ;;  %s1698_s30 = sld [smem:[#allocation2 + $0x16]] }
  0x6b   :  { %425 = vrot.lane.b32.xlu1 %v423_v11, %s3193_s21  ;;  %v586_v11 = vstv %s1689_s14  ;;  %s1697_s14 = sld [smem:[#allocation2 + $0x4b]] }
  0x6c   :  { %415 = vrot.lane.b32.xlu0 %v413_v12, %s3192_s18  ;;  %v597_v12 = vmul.f32 %v596_v8, %v2166_v6  ;;  %v587_v15 = vmul.f32 %v586_v11, %v2166_v6  ;;  %v636_v24 = vstv %s1694_s3  ;;  %s1700_s20 = sld [smem:[#allocation2 + $0x4c]] }
  0x6d   :  { %s1702_s3 = sld [smem:[#allocation2 + $0x32]] }
  0x6e   :  { %v656_v32 = vstv %s1696_s11  ;;  %s1704_s11 = sld [smem:[#allocation2 + $0x18]] }
  0x6f   :  { %445 = vrot.lane.b32.xlu1 %v443_v19, %s3193_s21  ;;  %v606_v19 = vstv %s1691_s22  ;;  %s1699_s22 = sld [smem:[#allocation2 + $0x31]] }
  0x70   :  { %435 = vrot.lane.b32.xlu0 %v433_v20, %s3193_s21  ;;  %v617_v20 = vmul.f32 %v616_v16, %v2166_v6  ;;  %v607_v23 = vmul.f32 %v606_v19, %v2166_v6  ;;  %v676_v40 = vstv %s1698_s30  ;;  %s1706_s30 = sld [smem:[#allocation2 + $0x4e]] }
  0x71   :  { %s2230_s12 = sld [smem:[#allocation7]] }
  0x72   :  { %v696_v48 = vstv %s1700_s20  ;;  %s1708_s20 = sld [smem:[#allocation2 + $0x34]] }
  0x73   :  { %465 = vrot.lane.b32.xlu1 %v463_v27, %s3194_s17  ;;  %v626_v27 = vstv %s1693_s6  ;;  %s1701_s6 = sld [smem:[#allocation2 + $0x17]]  ;;  %v716_v57 = vstv %s1702_s3 }
  0x74   :  { %455 = vrot.lane.b32.xlu0 %v453_v28, %s3194_s17  ;;  %v637_v28 = vmul.f32 %v636_v24, %v2166_v6  ;;  %v627_v31 = vmul.f32 %v626_v27, %v2166_v6  ;;  %v717_v63 = vmul.f32 %v716_v57, %v2166_v6  ;;  %s2208_s3 = sld [smem:[#allocation2 + $0x1a]] }
  0x75   :  { %s2349_s23 = sld [smem:[#allocation2 + $0x24]] }
  0x76   :  { %v756_v19 = vstv %s1706_s30  ;;  %s2224_s30 = sld [smem:[#allocation2 + $0x35]] }
  0x77   :  { %485 = vrot.lane.b32.xlu1 %v483_v35, %s3195_s16  ;;  %v646_v35 = vstv %s1695_s1  ;;  %s1703_s1 = sld [smem:[#allocation2 + $0x4d]]  ;;  %v757_v27 = vmul.f32 %v756_v19, %v2166_v6 }
  0x78   :  { %475 = vrot.lane.b32.xlu0 %v473_v36, %s3194_s17  ;;  %v657_v36 = vmul.f32 %v656_v32, %v2166_v6  ;;  %v647_v39 = vmul.f32 %v646_v35, %v2166_v6  ;;  %s2353_s24 = sld [smem:[#allocation2 + $0x3f]] }
  0x79   :  { %s2447_s8 = sld [smem:[#allocation2 + $0x27]] }
  0x7a   :  { %s2451_s10 = sld [smem:[#allocation2 + $0xc]] }
  0x7b   :  { %505 = vrot.lane.b32.xlu1 %v503_v43, %s3195_s16  ;;  %v666_v43 = vstv %s1697_s14  ;;  %s1705_s14 = sld [smem:[#allocation2 + $0x33]] }
  0x7c   :  { %495 = vrot.lane.b32.xlu0 %v493_v44, %s3195_s16  ;;  %v677_v44 = vmul.f32 %v676_v40, %v2166_v6  ;;  %v667_v47 = vmul.f32 %v666_v43, %v2166_v6  ;;  %v796_v43 = vstv %s2208_s3  ;;  %s2251_s3 = sld [smem:[#allocation7 + $0x1]] }
  0x7d   :  { %v726_v11 = vstv %s1703_s1  ;;  %s2220_s1 = sld [smem:[#allocation2 + $0x50]] }
  0x7e   :  { %v727_v16 = vmul.f32 %v726_v11, %v2166_v6  ;;  %v2259_v11 = vld [vmem:[#allocation8 + $0x3] ss:$8 sm:$0x7]  ;;  %s2556_s25 = sld [smem:[#allocation2 + $0x28]] }
  0x7f   :  { %525 = vrot.lane.b32.xlu1 %v523_v52, %s3196_s15  ;;  %v686_v52 = vstv %s1699_s22  ;;  %s1707_s22 = sld [smem:[#allocation2 + $0x19]] }
  0x80   :  { %515 = vrot.lane.b32.xlu0 %v513_v53, %s3196_s15  ;;  %v697_v53 = vmul.f32 %v696_v48, %v2166_v6  ;;  %v687_v56 = vmul.f32 %v686_v52, %v2166_v6  ;;  %s2561_s2 = sld [smem:[#allocation2 + $0x48]] }
  0x81   :  { %s2577_s26 = sld [smem:[#allocation2 + $0x29]] }
  0x82   :  { %s2582_s27 = sld [smem:[#allocation2 + $0xe]] }
  0x83   :  { %545 = vrot.lane.b32.xlu1 %v543_v60, %s3197_s13  ;;  %v816_v57 = vstv %s2220_s1  ;;  %s2594_s28 = sld [smem:[#allocation2 + $0xf]] }
  0x84   :  { %535 = vrot.lane.b32.xlu0 %v533_v61, %s3196_s15  ;;  %v706_v61 = vstv %s1701_s6  ;;  %s1709_s6 = sld [smem:[#allocation2 + $0x4f]] }
  0x85   :  { %v766_v35 = vstv %s1707_s22  ;;  %s2243_s22 = sld [smem:[#allocation7 + $0x2]] }
  0x86   :  { %v767_v40 = vmul.f32 %v766_v35, %v2166_v6  ;;  %s2598_s29 = sld [smem:[#allocation2 + $0x44]] }
  0x87   :  { %565 = vrot.lane.b32.xlu1 %v563_v2, %s3197_s13  ;;  %v707_v2 = vmul.f32 %v706_v61, %v2166_v6  ;;  %s2616_s4 = sld [smem:[#allocation2 + $0x45]] }
  0x88   :  { %555 = vrot.lane.b32.xlu0 %v553_v4, %s3197_s13  ;;  %v736_v4 = vstv %s1704_s11  ;;  %s2214_s11 = sld [smem:[#allocation2]] }
  0x89   :  { %s2622_s5 = sld [smem:[#allocation2 + $0x2a]] }
  0x8a   :  { %s1763_s7 = sld [smem:[#allocation2 + $0x2b]] }
  0x8b   :  { %599 = vrot.lane.b32.xlu1 %v597_v12, %s3190_s0  ;;  %s2645_s9 = sld [smem:[#allocation2 + $0x11]] }
  0x8c   :  { %589 = vrot.lane.b32.xlu0 %v587_v15, %s3190_s0  ;;  %v737_v15 = vmul.f32 %v736_v4, %v2166_v6  ;;  %s2662_s1 = sld [smem:[#allocation2 + $0x2e]] }
  0x8e   :  { %v58_v52 = vstv %s2214_s11  ;;  %s2658_s11 = sld [smem:[#allocation2 + $0x2c]] }
  0x8f   :  { %619 = vrot.lane.b32.xlu1 %v617_v20, %s3191_s19 }
  0x90   :  { %609 = vrot.lane.b32.xlu0 %v607_v23, %s3190_s0  ;;  %v746_v23 = vstv %s1705_s14  ;;  %s2226_s14 = sld [smem:[#allocation2 + $0x36]] }
  0x93   :  { %639 = vrot.lane.b32.xlu1 %v637_v28, %s3191_s19  ;;  %v747_v28 = vmul.f32 %v746_v23, %v2166_v6  ;;  %v817_v23 = vmul.f32 %v816_v57, %v2166_v6  ;;  %v55_v57 = vstv %s2243_s22  ;;  %s2481_s22 = sld [smem:[#allocation2 + $0x2d]] }
  0x94   :  { %629 = vrot.lane.b32.xlu0 %v627_v31, %s3191_s19  ;;  %v776_v31 = vstv %s1708_s20  ;;  %s2237_s20 = sld [smem:[#allocation2 + $0x1b]] }
  0x97   :  { %659 = vrot.lane.b32.xlu1 %v657_v36, %s3192_s18 }
  0x98   :  { %649 = vrot.lane.b32.xlu0 %v647_v39, %s3192_s18  ;;  %v777_v39 = vmul.f32 %v776_v31, %v2166_v6 }
  0x9a   :  { %v62_v31 = vstv %s2237_s20  ;;  %s2674_s20 = sld [smem:[#allocation2 + $0x49]] }
  0x9b   :  { %679 = vrot.lane.b32.xlu1 %v677_v44, %s3193_s21 }
  0x9c   :  { %669 = vrot.lane.b32.xlu0 %v667_v47, %s3192_s18  ;;  %v786_v47 = vstv %s1709_s6  ;;  %s2455_s6 = sld [smem:[#allocation2 + $0xd]] }
  0x9d   :  { %v2192_v60 = vpop.permute.xlu1 %94 }
  0x9e   :  { %v2194_v62 = vpop.permute.xlu0 %73 }
  0x9f   :  { %699 = vrot.lane.b32.xlu1 %v697_v53, %s3193_s21  ;;  %v797_v53 = vmul.f32 %v796_v43, %v2166_v6  ;;  %v75_v19 = vrot.slane %v2194_v62, 1 }
  0xa0   :  { %689 = vrot.lane.b32.xlu0 %v687_v56, %s3193_s21  ;;  %v787_v56 = vmul.f32 %v786_v47, %v2166_v6 }
  0xa1   :  { %v2200_v8 = vpop.permute.xlu1 %104 }
  0xa2   :  { %v2202_v12 = vpop.permute.xlu0 %84 }
  0xa3   :  { %719 = vrot.lane.b32.xlu1 %v717_v63, %s3194_s17  ;;  %v806_v63 = vstv %s2224_s30  ;;  %s2461_s30 = sld [smem:[#allocation2 + $0x42]] }
  0xa4   :  { %709 = vrot.lane.b32.xlu0 %v707_v2, %s3194_s17  ;;  %v59_v2 = vmul.f32 %v58_v52, %v1926_v0 }
  0xa5   :  { %v2210_v20 = vpop.permute.xlu1 %125 }
  0xa6   :  { %v2212_v24 = vpop.permute.xlu0 %115 }
  0xa7   :  { %739 = vrot.lane.b32.xlu1 %v737_v15, %s3195_s16  ;;  %v66_v15 = vstv %s2226_s14  ;;  %s2670_s14 = sld [smem:[#allocation2 + $0x14]] }
  0xa8   :  { %729 = vrot.lane.b32.xlu0 %v727_v16, %s3194_s17  ;;  %v51_v16 = vstv %s2230_s12  ;;  %v67_v43 = vmul.f32 %v66_v15, %v1926_v0  ;;  %s2285_s12 = sld [smem:[#allocation2 + $0x9]]  ;;  %v53_v15 = vstv %s2251_s3 }
  0xa9   :  { %v2222_v32 = vpop.permute.xlu1 %146  ;;  %v60_v47 = vadd.f32 %v59_v2, %v51_v16  ;;  %v2303_v2 = vmul.f32 %v2259_v11, %v112_v10  ;;  %v86_v16 = vrot.slane %v2202_v12, 1  ;;  %s3212_s3 = sld [smem:[#allocation28_spill]] }
  0xaa   :  { %v2228_v36 = vpop.permute.xlu0 %135 }
  0xab   :  { %759 = vrot.lane.b32.xlu1 %v757_v27, %s3195_s16  ;;  %v807_v27 = vmul.f32 %v806_v63, %v2166_v6  ;;  %v2295_v63 = vmul.f32 %v2259_v11, %v122_v9 }
  0xac   :  { %749 = vrot.lane.b32.xlu0 %v747_v28, %s3195_s16  ;;  %v106_v28 = vrot.slane %v2200_v8, 1 }
  0xad   :  { %v2239_v44 = vpop.permute.xlu1 %166 }
  0xae   :  { %v2241_v48 = vpop.permute.xlu0 %156  ;;  %v108_v9 = vsel %vm107_vm1, %v2200_v8, %v106_v28  ;;  %v117_v8 = vrot.slane %v2212_v24, 1 }
  0xaf   :  { %779 = vrot.lane.b32.xlu1 %v777_v39, %s3196_s15  ;;  %v869_v39 = vmul.f32 %v2259_v11, %v81_v7  ;;  %v96_v7 = vrot.slane %v2192_v60, 1  ;;  %v158_v28 = vrot.slane %v2241_v48, 1 }
  0xb0   :  { %769 = vrot.lane.b32.xlu0 %v767_v40, %s3196_s15  ;;  %v859_v40 = vmul.f32 %v2259_v11, %v70_v3  ;;  %v77_v3 = vsel %vm76_vm0, %v2194_v62, %v75_v19  ;;  %v2308_v62 = vmul.f32 %v2259_v11, %v143_v13  ;;  %v2319_v13 = vmul.f32 %v2259_v11, %v132_v14 }
  0xb1   :  { %v2253_v61 = vpop.permute.xlu1 %187  ;;  %v97_v59 = vsel %vm76_vm0, %v2192_v60, %v96_v7  ;;  %v87_v60 = vsel %vm76_vm0, %v2202_v12, %v86_v16 }
  0xb2   :  { %v2257_v4 = vpop.permute.xlu0 %177 }
  0xb3   :  { %799 = vrot.lane.b32.xlu1 %v797_v53, %s3197_s13  ;;  %v889_v53 = vmul.f32 %v2259_v11, %v101_v5  ;;  %v63_v5 = vmul.f32 %v62_v31, %v1926_v0  ;;  %v127_v0 = vrot.slane %v2210_v20, 1  ;;  %v168_v31 = vrot.slane %v2239_v44, 1 }
  0xb4   :  { %789 = vrot.lane.b32.xlu0 %v787_v56, %s3196_s15  ;;  %v879_v56 = vmul.f32 %v2259_v11, %v91_v1  ;;  %v137_v1 = vrot.slane %v2228_v36, 1  ;;  %v179_v16 = vrot.slane %v2257_v4, 1 }
  0xb5   :  { %v2270_v35 = vpop.permute.xlu1 %208  ;;  %v128_v7 = vsel %vm107_vm1, %v2210_v20, %v127_v0  ;;  %v159_v20 = vsel %vm138_vm2, %v2241_v48, %v158_v28 }
  0xb6   :  { %v198_v52 = vpop.permute.xlu0 %197  ;;  %v139_v14 = vsel %vm138_vm2, %v2228_v36, %v137_v1 }
  0xb7   :  { %819 = vrot.lane.b32.xlu1 %v817_v23, %s3197_s13  ;;  %v68_v23 = vadd.f32 %v67_v43, %v55_v57  ;;  %v2329_v43 = vmul.f32 %v2259_v11, %v163_v17  ;;  %v64_v57 = vadd.f32 %v63_v5, %v53_v15  ;;  %v189_v17 = vrot.slane %v2253_v61, 1 }
  0xb8   :  { %809 = vrot.lane.b32.xlu0 %v807_v27, %s3197_s13  ;;  %v79_v27 = vadd.f32 %v77_v3, %v60_v47  ;;  %v199_v3 = vrot.slane %v198_v52, 1  ;;  %v170_v5 = vsel %vm169_vm3, %v2239_v44, %v168_v31  ;;  %v320_v15 = vstv %s2285_s12  ;;  %s3213_s12 = sld [smem:[#allocation29_spill]] }
  0xb9   :  { %v229_v19 = vpop.permute.xlu1 %228  ;;  %v190_v48 = vsel %vm169_vm3, %v2253_v61, %v189_v17 }
  0xba   :  { %v219_v10 = vpop.permute.xlu0 %218  ;;  %v110_v47 = vadd.f32 %v108_v9, %v79_v27  ;;  %v99_v9 = vadd.f32 %v97_v59, %v68_v23  ;;  %v230_v36 = vrot.slane %v229_v19, 1  ;;  %v89_v59 = vadd.f32 %v87_v60, %v64_v57 }
  0xbb   :  { %871 = vrot.lane.b32.xlu1 %v869_v39, %s3190_s0  ;;  %v148_v39 = vrot.slane %v2222_v32, 1  ;;  %v201_v44 = vsel %vm200_vm4, %v198_v52, %v199_v3  ;;  %v220_v23 = vrot.slane %v219_v10, 1 }
  0xbc   :  { %861 = vrot.lane.b32.xlu0 %v859_v40, %s3190_s0  ;;  %v118_v40 = vsel %vm107_vm1, %v2212_v24, %v117_v8  ;;  %v141_v12 = vadd.f32 %v139_v14, %v110_v47  ;;  %v130_v0 = vadd.f32 %v128_v7, %v99_v9  ;;  %v232_v52 = vsel %vm231_vm5, %v229_v19, %v230_v36 }
  0xbd   :  { %v250_v58 = vpop.permute.xlu1 %249  ;;  %v149_v24 = vsel %vm138_vm2, %v2222_v32, %v148_v39  ;;  %v120_v8 = vadd.f32 %v118_v40, %v89_v59  ;;  %v221_v7 = vsel %vm200_vm4, %v219_v10, %v220_v23  ;;  %v939_v19 = vmul.f32 %v2259_v11, %v153_v18 }
  0xbe   :  { %v240_v1 = vpop.permute.xlu0 %239  ;;  %v172_v27 = vadd.f32 %v170_v5, %v141_v12  ;;  %v161_v28 = vadd.f32 %v159_v20, %v130_v0  ;;  %v251_v47 = vrot.slane %v250_v58, 1  ;;  %v328_v0 = vstv %s2353_s24  ;;  %s2548_s24 = sld [smem:[#allocation2 + $0x43]] }
  0xbf   :  { %891 = vrot.lane.b32.xlu1 %v889_v53, %s3191_s19  ;;  %v210_v53 = vrot.slane %v2270_v35, 1  ;;  %v241_v3 = vrot.slane %v240_v1, 1  ;;  %v151_v61 = vadd.f32 %v149_v24, %v120_v8 }
  0xc0   :  { %881 = vrot.lane.b32.xlu0 %v879_v56, %s3190_s0  ;;  %v180_v56 = vsel %vm169_vm3, %v2257_v4, %v179_v16  ;;  %v203_v14 = vadd.f32 %v201_v44, %v172_v27  ;;  %v192_v60 = vadd.f32 %v190_v48, %v161_v28  ;;  %v252_v36 = vsel %vm231_vm5, %v250_v58, %v251_v47 }
  0xc1   :  { %v271_v31 = vpop.permute.xlu1 %270  ;;  %v211_v39 = vsel %vm200_vm4, %v2270_v35, %v210_v53  ;;  %v182_v5 = vadd.f32 %v180_v56, %v151_v61  ;;  %v242_v18 = vsel %vm231_vm5, %v240_v1, %v241_v3  ;;  %v324_v58 = vstv %s2349_s23  ;;  %s2496_s23 = sld [smem:[#allocation2 + $0x12]] }
  0xc2   :  { %v260_v57 = vpop.permute.xlu0 %259  ;;  %v234_v4 = vadd.f32 %v232_v52, %v203_v14  ;;  %v272_v17 = vrot.slane %v271_v31, 1  ;;  %v223_v12 = vadd.f32 %v221_v7, %v192_v60 }
  0xc3   :  { %v261_v32 = vrot.slane %v260_v57, 1  ;;  %911 = vrot.lane.b32.xlu1 %v2295_v63, %s3191_s19  ;;  %v213_v16 = vadd.f32 %v211_v39, %v182_v5  ;;  %v1009_v39 = vmul.f32 %v2259_v11, %v225_v29  ;;  %v1019_v29 = vmul.f32 %v2259_v11, %v236_v34 }
  0xc4   :  { %901 = vrot.lane.b32.xlu0 %v2303_v2, %s3191_s19  ;;  %v321_v2 = vmul.f32 %v320_v15, %v2094_v49  ;;  %v254_v44 = vadd.f32 %v252_v36, %v223_v12  ;;  %v273_v15 = vsel %vm262_vm6, %v271_v31, %v272_v17  ;;  %v329_v31 = vmul.f32 %v328_v0, %v2094_v49 }
  0xc5   :  { %v263_v9 = vsel %vm262_vm6, %v260_v57, %v261_v32  ;;  %v291_v63 = vpop.permute.xlu1 %290  ;;  %v244_v27 = vadd.f32 %v242_v18, %v213_v16  ;;  %v325_v57 = vmul.f32 %v324_v58, %v2094_v49  ;;  %v989_v49 = vmul.f32 %v2259_v11, %v205_v25 }
  0xc6   :  { %v292_v10 = vrot.slane %v291_v63, 1  ;;  %v281_v40 = vpop.permute.xlu0 %280  ;;  %v265_v20 = vadd.f32 %v263_v9, %v234_v4  ;;  %v999_v25 = vmul.f32 %v2259_v11, %v215_v30  ;;  %v1049_v30 = vmul.f32 %v2259_v11, %v267_v37 }
  0xc7   :  { %v282_v35 = vrot.slane %v281_v40, 1  ;;  %931 = vrot.lane.b32.xlu1 %v2308_v62, %s3192_s18  ;;  %v969_v62 = vmul.f32 %v2259_v11, %v184_v21  ;;  %v275_v52 = vadd.f32 %v273_v15, %v244_v27  ;;  %v959_v21 = vmul.f32 %v2259_v11, %v174_v22 }
  0xc8   :  { %v294_v59 = vsel %vm293_vm7, %v291_v63, %v292_v10  ;;  %921 = vrot.lane.b32.xlu0 %v2319_v13, %s3192_s18  ;;  %v979_v22 = vmul.f32 %v2259_v11, %v194_v26  ;;  %v1029_v26 = vmul.f32 %v2259_v11, %v246_v33  ;;  %v1039_v33 = vmul.f32 %v2259_v11, %v256_v38 }
  0xc9   :  { %v296_v23 = vadd.f32 %v294_v59, %v265_v20  ;;  %v283_v1 = vsel %vm262_vm6, %v281_v40, %v282_v35  ;;  %v312_v24 = vpop.permute.xlu1 %311  ;;  %v1069_v37 = vmul.f32 %v2259_v11, %v287_v41  ;;  %v1059_v38 = vmul.f32 %v2259_v11, %v277_v42  ;;  %v2471_v40 = vld [vmem:[#allocation8 + $0x4] ss:$8 sm:$0x7] }
  0xca   :  { %v313_v48 = vrot.slane %v312_v24, 1  ;;  %v302_v53 = vpop.permute.xlu0 %301  ;;  %v285_v8 = vadd.f32 %v283_v1, %v254_v44  ;;  %v1089_v41 = vmul.f32 %v2259_v11, %v308_v45  ;;  %v1079_v42 = vmul.f32 %v2259_v11, %v298_v46 }
  0xcb   :  { %v303_v28 = vrot.slane %v302_v53, 1  ;;  %951 = vrot.lane.b32.xlu1 %v2329_v43, %s3193_s21  ;;  %v2391_v13 = vadd.f32 %v321_v2, %v296_v23  ;;  %v1123_v18 = vmul.f32 %v2471_v40, %v342_v50  ;;  %v1113_v20 = vmul.f32 %v2471_v40, %v332_v51 }
  0xcc   :  { %v314_v47 = vsel %vm293_vm7, %v312_v24, %v313_v48  ;;  %941 = vrot.lane.b32.xlu0 %v939_v19, %s3192_s18  ;;  %v1143_v16 = vmul.f32 %v2471_v40, %v362_v54  ;;  %v1182_v59 = vstv %s2447_s8  ;;  %v1172_v58 = vstv %s2451_s10  ;;  %s1762_s8 = sld [smem:[#allocation2 + $0x10]] }
  0xcd   :  { %v316_v56 = vadd.f32 %v314_v47, %v285_v8  ;;  %v304_v43 = vsel %vm293_vm7, %v302_v53, %v303_v28  ;;  %v2401_v14 = vpop.permute.xlu1 %345  ;;  %v1133_v50 = vmul.f32 %v2471_v40, %v352_v55  ;;  %v1202_v0 = vstv %s2455_s6  ;;  %s2650_s10 = sld [smem:[#allocation2 + $0x46]] }
  0xce   :  { %v306_v3 = vadd.f32 %v304_v43, %v275_v52  ;;  %v336_v32 = vpop.permute.xlu0 %335  ;;  %v1192_v51 = vstv %s2461_s30  ;;  %v347_v44 = vrot.slane %v2401_v14, 1  ;;  %v3214_v54 = vstv %s3212_s3  ;;  %s2654_s6 = sld [smem:[#allocation2 + $0x47]] }
  0xcf   :  { %971 = vrot.lane.b32.xlu1 %v969_v62, %s3193_s21  ;;  %v2404_v61 = vadd.f32 %v329_v31, %v316_v56  ;;  %v337_v2 = vrot.slane %v336_v32, 1  ;;  %v1163_v1 = vmul.f32 %v2471_v40, %v3214_v54  ;;  %v3215_v48 = vstv %s3213_s12  ;;  %s2666_s30 = sld [smem:[#allocation2 + $0x13]] }
  0xd0   :  { %v2409_v60 = vadd.f32 %v325_v57, %v306_v3  ;;  %961 = vrot.lane.b32.xlu0 %v959_v21, %s3193_s21  ;;  %v1153_v53 = vmul.f32 %v2471_v40, %v3215_v48  ;;  %v2516_v55 = vmul.f32 %v1182_v59, %v2471_v40  ;;  %v2519_v62 = vmul.f32 %v1172_v58, %v2471_v40  ;;  %s2679_s3 = sld [smem:[#allocation2 + $0x4a]] }
  0xd1   :  { %v366_v7 = vpop.permute.xlu1 %365  ;;  %v338_v15 = vsel %vm76_vm0, %v336_v32, %v337_v2  ;;  %v2524_v52 = vmul.f32 %v1202_v0, %v2471_v40  ;;  %v2527_v47 = vmul.f32 %v1192_v51, %v2471_v40  ;;  %v348_v3 = vsel %vm76_vm0, %v2401_v14, %v347_v44  ;;  %s2684_s12 = sld [smem:[#allocation2 + $0x2f]] }
  0xd2   :  { %v2415_v19 = vpop.permute.xlu0 %355  ;;  %v367_v45 = vrot.slane %v366_v7, 1  ;;  %v340_v57 = vadd.f32 %v338_v15, %v2391_v13 }
  0xd3   :  { %991 = vrot.lane.b32.xlu1 %v989_v49, %s3194_s17  ;;  %v357_v46 = vrot.slane %v2415_v19, 1 }
  0xd4   :  { %981 = vrot.lane.b32.xlu0 %v979_v22, %s3194_s17  ;;  %v368_v8 = vsel %vm107_vm1, %v366_v7, %v367_v45  ;;  %v578_v22 = vstv %s2481_s22 }
  0xd5   :  { %v2425_v4 = vpop.permute.xlu1 %385  ;;  %v358_v21 = vsel %vm76_vm0, %v2415_v19, %v357_v46  ;;  %v370_v13 = vadd.f32 %v368_v8, %v340_v57  ;;  %v1222_v8 = vstv %s2548_s24  ;;  %s2688_s24 = sld [smem:[#allocation2 + $0x30]] }
  0xd6   :  { %v2427_v17 = vpop.permute.xlu0 %375  ;;  %v387_v24 = vrot.slane %v2425_v4, 1 }
  0xd7   :  { %1011 = vrot.lane.b32.xlu1 %v1009_v39, %s3195_s16  ;;  %v377_v56 = vrot.slane %v2427_v17, 1 }
  0xd8   :  { %1001 = vrot.lane.b32.xlu0 %v999_v25, %s3194_s17  ;;  %v388_v7 = vsel %vm107_vm1, %v2425_v4, %v387_v24 }
  0xd9   :  { %v2437_v9 = vpop.permute.xlu1 %405 }
  0xda   :  { %v396_v63 = vpop.permute.xlu0 %395  ;;  %v407_v19 = vrot.slane %v2437_v9, 1 }
  0xdb   :  { %1031 = vrot.lane.b32.xlu1 %v1029_v26, %s3195_s16  ;;  %v397_v23 = vrot.slane %v396_v63, 1  ;;  %v360_v26 = vadd.f32 %v358_v21, %v2404_v61  ;;  %v350_v61 = vadd.f32 %v348_v3, %v2409_v60  ;;  %v582_v3 = vstv %s2561_s2 }
  0xdc   :  { %1021 = vrot.lane.b32.xlu0 %v1019_v29, %s3195_s16 }
  0xdd   :  { %v2449_v5 = vpop.permute.xlu1 %425  ;;  %v398_v32 = vsel %vm138_vm2, %v396_v63, %v397_v23 }
  0xde   :  { %v2453_v34 = vpop.permute.xlu0 %415  ;;  %v427_v28 = vrot.slane %v2449_v5, 1 }
  0xdf   :  { %1051 = vrot.lane.b32.xlu1 %v1049_v30, %s3196_s15  ;;  %v417_v43 = vrot.slane %v2453_v34, 1  ;;  %v574_v30 = vstv %s2496_s23 }
  0xe0   :  { %1041 = vrot.lane.b32.xlu0 %v1039_v33, %s3196_s15  ;;  %v428_v14 = vsel %vm169_vm3, %v2449_v5, %v427_v28  ;;  %v378_v33 = vsel %vm107_vm1, %v2427_v17, %v377_v56  ;;  %v390_v5 = vadd.f32 %v388_v7, %v360_v26  ;;  %v408_v17 = vsel %vm138_vm2, %v2437_v9, %v407_v19 }
  0xe1   :  { %v2467_v36 = vpop.permute.xlu1 %445  ;;  %v418_v4 = vsel %vm138_vm2, %v2453_v34, %v417_v43  ;;  %v380_v60 = vadd.f32 %v378_v33, %v350_v61  ;;  %v575_v44 = vmul.f32 %v574_v30, %v2166_v6  ;;  %v1212_v43 = vstv %s2556_s25  ;;  %s2692_s25 = sld [smem:[#allocation2 + $0x15]] }
  0xe2   :  { %v2469_v10 = vpop.permute.xlu0 %435  ;;  %v447_v39 = vrot.slane %v2467_v36, 1  ;;  %v420_v45 = vadd.f32 %v418_v4, %v390_v5  ;;  %v1223_v26 = vmul.f32 %v1222_v8, %v2471_v40  ;;  %v583_v33 = vmul.f32 %v582_v3, %v2166_v6 }
  0xe3   :  { %1071 = vrot.lane.b32.xlu1 %v1069_v37, %s3197_s13  ;;  %v400_v37 = vadd.f32 %v398_v32, %v370_v13  ;;  %v410_v0 = vadd.f32 %v408_v17, %v380_v60  ;;  %v1242_v61 = vstv %s2577_s26  ;;  %s2700_s26 = sld [smem:[#allocation2 + $0x16]] }
  0xe4   :  { %1061 = vrot.lane.b32.xlu0 %v1059_v38, %s3196_s15  ;;  %v437_v38 = vrot.slane %v2469_v10, 1 }
  0xe5   :  { %v2483_v12 = vpop.permute.xlu1 %465  ;;  %v430_v34 = vadd.f32 %v428_v14, %v400_v37 }
  0xe6   :  { %v456_v35 = vpop.permute.xlu0 %455  ;;  %v438_v58 = vsel %vm169_vm3, %v2469_v10, %v437_v38  ;;  %v1213_v38 = vmul.f32 %v1212_v43, %v2471_v40 }
  0xe7   :  { %1091 = vrot.lane.b32.xlu1 %v1089_v41, %s3197_s13  ;;  %v457_v49 = vrot.slane %v456_v35, 1  ;;  %v440_v24 = vadd.f32 %v438_v58, %v410_v0  ;;  %v1282_v58 = vstv %s2616_s4  ;;  %s2789_s4 = sld [smem:[#allocation2 + $0x31]] }
  0xe8   :  { %1081 = vrot.lane.b32.xlu0 %v1079_v42, %s3197_s13  ;;  %v448_v42 = vsel %vm169_vm3, %v2467_v36, %v447_v39  ;;  %v1283_v0 = vmul.f32 %v1282_v58, %v2471_v40 }
  0xe9   :  { %v486_v27 = vpop.permute.xlu1 %485  ;;  %v458_v41 = vsel %vm200_vm4, %v456_v35, %v457_v49  ;;  %v450_v36 = vadd.f32 %v448_v42, %v420_v45  ;;  %v1252_v45 = vstv %s2598_s29  ;;  %s2780_s29 = sld [smem:[#allocation2 + $0x4c]] }
  0xea   :  { %v476_v31 = vpop.permute.xlu0 %475  ;;  %v487_v29 = vrot.slane %v486_v27, 1  ;;  %v460_v46 = vadd.f32 %v458_v41, %v430_v34  ;;  %v1243_v34 = vmul.f32 %v1242_v61, %v2471_v40 }
  0xeb   :  { %1125 = vrot.lane.b32.xlu1 %v1123_v18, %s3190_s0  ;;  %v477_v2 = vrot.slane %v476_v31, 1  ;;  %v467_v18 = vrot.slane %v2483_v12, 1 }
  0xec   :  { %1115 = vrot.lane.b32.xlu0 %v1113_v20, %s3190_s0  ;;  %v488_v35 = vsel %vm231_vm5, %v486_v27, %v487_v29 }
  0xed   :  { %v506_v25 = vpop.permute.xlu1 %505  ;;  %v478_v51 = vsel %vm200_vm4, %v476_v31, %v477_v2  ;;  %v468_v10 = vsel %vm200_vm4, %v2483_v12, %v467_v18  ;;  %v490_v15 = vadd.f32 %v488_v35, %v460_v46  ;;  %v1232_v2 = vstv %s2582_s27  ;;  %s2723_s27 = sld [smem:[#allocation2 + $0x4b]] }
  0xee   :  { %v496_v63 = vpop.permute.xlu0 %495  ;;  %v480_v28 = vadd.f32 %v478_v51, %v450_v36  ;;  %v470_v21 = vadd.f32 %v468_v10, %v440_v24  ;;  %v1233_v18 = vmul.f32 %v1232_v2, %v2471_v40  ;;  %v1302_v51 = vstv %s1763_s7  ;;  %s2804_s7 = sld [smem:[#allocation2 + $0x36]] }
  0xef   :  { %1145 = vrot.lane.b32.xlu1 %v1143_v16, %s3191_s19  ;;  %v507_v16 = vrot.slane %v506_v25, 1  ;;  %v1292_v10 = vstv %s1762_s8  ;;  %s2810_s8 = sld [smem:[#allocation2 + $0x32]] }
  0xf0   :  { %1135 = vrot.lane.b32.xlu0 %v1133_v50, %s3190_s0  ;;  %v497_v50 = vrot.slane %v496_v63, 1 }
  0xf1   :  { %v526_v20 = vpop.permute.xlu1 %525  ;;  %v508_v27 = vsel %vm231_vm5, %v506_v25, %v507_v16 }
  0xf2   :  { %v516_v59 = vpop.permute.xlu0 %515  ;;  %v527_v23 = vrot.slane %v526_v20, 1  ;;  %v498_v31 = vsel %vm231_vm5, %v496_v63, %v497_v50  ;;  %v510_v32 = vadd.f32 %v508_v27, %v480_v28  ;;  %v1272_v50 = vstv %s2622_s5  ;;  %s2796_s5 = sld [smem:[#allocation2 + $0x1b]] }
  0xf3   :  { %v517_v9 = vrot.slane %v516_v59, 1  ;;  %1165 = vrot.lane.b32.xlu1 %v1163_v1, %s3191_s19  ;;  %v1273_v36 = vmul.f32 %v1272_v50, %v2471_v40  ;;  %v1312_v27 = vstv %s2650_s10  ;;  %v1342_v28 = vstv %s2654_s6  ;;  %s2824_s10 = sld [smem:[#allocation7 + $0x2]] }
  0xf4   :  { %1155 = vrot.lane.b32.xlu0 %v1153_v53, %s3191_s19  ;;  %v528_v49 = vsel %vm262_vm6, %v526_v20, %v527_v23  ;;  %v1262_v20 = vstv %s2594_s28  ;;  %v1303_v23 = vmul.f32 %v1302_v51, %v2471_v40  ;;  %v1313_v8 = vmul.f32 %v1312_v27, %v2471_v40  ;;  %s2772_s28 = sld [smem:[#allocation2]] }
  0xf5   :  { %v518_v54 = vsel %vm262_vm6, %v516_v59, %v517_v9  ;;  %v546_v1 = vpop.permute.xlu1 %545  ;;  %v1263_v16 = vmul.f32 %v1262_v20, %v2471_v40  ;;  %v1253_v59 = vmul.f32 %v1252_v45, %v2471_v40  ;;  %v1343_v43 = vmul.f32 %v1342_v28, %v2471_v40  ;;  %s2831_s6 = sld [smem:[#allocation2 + $0x18]] }
  0xf6   :  { %v547_v48 = vrot.slane %v546_v1, 1  ;;  %v536_v53 = vpop.permute.xlu0 %535  ;;  %v520_v57 = vadd.f32 %v518_v54, %v490_v15  ;;  %v1293_v54 = vmul.f32 %v1292_v10, %v2471_v40  ;;  %v825_v20 = vlaneseq }
  0xf7   :  { %v537_v12 = vrot.slane %v536_v53, 1  ;;  %1185 = vrot.lane.b32.xlu1 %v2516_v55, %s3192_s18  ;;  %v500_v55 = vadd.f32 %v498_v31, %v470_v21  ;;  %v2704_v21 = vld [vmem:[#allocation8 + $0x5] ss:$8 sm:$0x7]  ;;  %v1456_v45 = vstv %s2700_s26 }
  0xf8   :  { %v548_v56 = vsel %vm293_vm7, %v546_v1, %v547_v48  ;;  %1175 = vrot.lane.b32.xlu0 %v2519_v62, %s3192_s18  ;;  %v579_v62 = vmul.f32 %v578_v22, %v2166_v6  ;;  %v1322_v1 = vstv %s2645_s9  ;;  %vm2785_vm8 = vcmp.lt.s32.totalorder %v825_v20, 288  ;;  %s2815_s9 = sld [smem:[#allocation2 + $0x17]] }
  0xf9   :  { %v550_v13 = vadd.f32 %v548_v56, %v520_v57  ;;  %v538_v7 = vsel %vm262_vm6, %v536_v53, %v537_v12  ;;  %v566_v19 = vpop.permute.xlu1 %565  ;;  %v530_v37 = vadd.f32 %v528_v49, %v500_v55  ;;  %v1323_v53 = vmul.f32 %v1322_v1, %v2471_v40 }
  0xfa   :  { %v567_v39 = vrot.slane %v566_v19, 1  ;;  %v556_v25 = vpop.permute.xlu0 %555  ;;  %v540_v14 = vadd.f32 %v538_v7, %v510_v32  ;;  %v1332_v57 = vstv %s2658_s11  ;;  %v1376_v56 = vstv %s2662_s1  ;;  %s2835_s11 = sld [smem:[#allocation2 + $0x4d]] }
  0xfb   :  { %v557_v29 = vrot.slane %v556_v25, 1  ;;  %1205 = vrot.lane.b32.xlu1 %v2524_v52, %s3193_s21  ;;  %v2606_v63 = vadd.f32 %v575_v44, %v550_v13  ;;  %v1366_v32 = vstv %s2666_s30  ;;  %v1396_v49 = vstv %s2670_s14  ;;  %s2849_s1 = sld [smem:[#allocation2 + $0x4e]] }
  0xfc   :  { %v568_v4 = vsel %vm293_vm7, %v566_v19, %v567_v39  ;;  %1195 = vrot.lane.b32.xlu0 %v2527_v47, %s3192_s18  ;;  %v1333_v7 = vmul.f32 %v1332_v57, %v2471_v40  ;;  %v1386_v19 = vstv %s2674_s20  ;;  %v1377_v39 = vmul.f32 %v1376_v56, %v2704_v21  ;;  %s2854_s30 = sld [smem:[#allocation2 + $0x33]] }
  0xfd   :  { %v570_v5 = vadd.f32 %v568_v4, %v540_v14  ;;  %v558_v52 = vsel %vm293_vm7, %v556_v25, %v557_v29  ;;  %v2619_v41 = vpop.permute.xlu1 %599  ;;  %v1416_v25 = vstv %s2679_s3  ;;  %v1367_v14 = vmul.f32 %v1366_v32, %v2704_v21  ;;  %s2871_s14 = sld [smem:[#allocation2 + $0x19]] }
  0xfe   :  { %v560_v6 = vadd.f32 %v558_v52, %v530_v37  ;;  %v2624_v17 = vpop.permute.xlu0 %589  ;;  %v1397_v29 = vmul.f32 %v1396_v49, %v2704_v21  ;;  %v1387_v40 = vmul.f32 %v1386_v19, %v2704_v21  ;;  %v1436_v4 = vstv %s2688_s24  ;;  %s2884_s20 = sld [smem:[#allocation2 + $0x4f]] }
  0xff   :  { %1225 = vrot.lane.b32.xlu1 %v1223_v26, %s3193_s21  ;;  %v2627_v47 = vadd.f32 %v583_v33, %v570_v5  ;;  %v591_v13 = vrot.slane %v2624_v17, 1  ;;  %v1406_v33 = vstv %s2684_s12  ;;  %v601_v61 = vrot.slane %v2619_v41, 1  ;;  %s2892_s3 = sld [smem:[#allocation2 + $0x50]] }
 0x100   :  { %v2630_v42 = vadd.f32 %v579_v62, %v560_v6  ;;  %1215 = vrot.lane.b32.xlu0 %v1213_v38, %s3193_s21  ;;  %v1426_v38 = vstv %s2692_s25  ;;  %v1417_v2 = vmul.f32 %v1416_v25, %v2704_v21  ;;  %v2745_v58 = vmul.f32 %v1436_v4, %v2704_v21  ;;  %s2896_s12 = sld [smem:[#allocation2 + $0x35]] }
 0x101   :  { %v2635_v60 = vpop.permute.xlu1 %619  ;;  %v592_v5 = vsel %vm76_vm0, %v2624_v17, %v591_v13  ;;  %v2748_v50 = vmul.f32 %v1426_v38, %v2704_v21  ;;  %v1446_v56 = vstv %s2723_s27 }
 0x102   :  { %v2638_v35 = vpop.permute.xlu0 %609  ;;  %v621_v62 = vrot.slane %v2635_v60, 1 }
 0x103   :  { %1245 = vrot.lane.b32.xlu1 %v1243_v34, %s3194_s17  ;;  %v611_v37 = vrot.slane %v2638_v35, 1 }
 0x104   :  { %1235 = vrot.lane.b32.xlu0 %v1233_v18, %s3194_s17  ;;  %v2738_v18 = vmul.f32 %v1406_v33, %v2704_v21 }
 0x105   :  { %v2647_v46 = vpop.permute.xlu1 %639 }
 0x106   :  { %v2652_v9 = vpop.permute.xlu0 %629  ;;  %v641_v6 = vrot.slane %v2647_v46, 1 }
 0x107   :  { %1265 = vrot.lane.b32.xlu1 %v1263_v16, %s3195_s16  ;;  %v622_v16 = vsel %vm107_vm1, %v2635_v60, %v621_v62  ;;  %v631_v51 = vrot.slane %v2652_v9, 1  ;;  %v602_v60 = vsel %vm76_vm0, %v2619_v41, %v601_v61 }
 0x108   :  { %1255 = vrot.lane.b32.xlu0 %v1253_v59, %s3194_s17  ;;  %v642_v1 = vsel %vm107_vm1, %v2647_v46, %v641_v6 }
 0x109   :  { %v2664_v44 = vpop.permute.xlu1 %659 }
 0x10a   :  { %v2668_v15 = vpop.permute.xlu0 %649  ;;  %v661_v27 = vrot.slane %v2664_v44, 1 }
 0x10b   :  { %1285 = vrot.lane.b32.xlu1 %v1283_v0, %s3195_s16  ;;  %v651_v52 = vrot.slane %v2668_v15, 1  ;;  %v594_v0 = vadd.f32 %v592_v5, %v2606_v63  ;;  %v2762_v63 = vmul.f32 %v1456_v45, %v2704_v21  ;;  %v1447_v5 = vmul.f32 %v1446_v56, %v2704_v21 }
 0x10c   :  { %1275 = vrot.lane.b32.xlu0 %v1273_v36, %s3195_s16  ;;  %v612_v36 = vsel %vm76_vm0, %v2638_v35, %v611_v37 }
 0x10d   :  { %v2681_v24 = vpop.permute.xlu1 %679  ;;  %v624_v35 = vadd.f32 %v622_v16, %v594_v0  ;;  %v614_v41 = vadd.f32 %v612_v36, %v2627_v47  ;;  %v604_v47 = vadd.f32 %v602_v60, %v2630_v42  ;;  %v1476_v60 = vstv %s2780_s29 }
 0x10e   :  { %v2686_v48 = vpop.permute.xlu0 %669  ;;  %v681_v59 = vrot.slane %v2681_v24, 1  ;;  %v1477_v56 = vmul.f32 %v1476_v60, %v2704_v21 }
 0x10f   :  { %1305 = vrot.lane.b32.xlu1 %v1303_v23, %s3196_s15  ;;  %v671_v10 = vrot.slane %v2686_v48, 1  ;;  %v652_v23 = vsel %vm138_vm2, %v2668_v15, %v651_v52 }
 0x110   :  { %1295 = vrot.lane.b32.xlu0 %v1293_v54, %s3196_s15  ;;  %v682_v15 = vsel %vm169_vm3, %v2681_v24, %v681_v59  ;;  %v654_v32 = vadd.f32 %v652_v23, %v624_v35  ;;  %v644_v24 = vadd.f32 %v642_v1, %v614_v41  ;;  %v846_v59 = vstv %s2772_s28 }
 0x111   :  { %v2697_v31 = vpop.permute.xlu1 %699  ;;  %v672_v46 = vsel %vm138_vm2, %v2686_v48, %v671_v10  ;;  %v662_v48 = vsel %vm138_vm2, %v2664_v44, %v661_v27  ;;  %v1466_v23 = vstv %s2789_s4 }
 0x112   :  { %v2702_v12 = vpop.permute.xlu0 %689  ;;  %v684_v19 = vadd.f32 %v682_v15, %v654_v32 }
 0x113   :  { %1325 = vrot.lane.b32.xlu1 %v1323_v53, %s3197_s13  ;;  %v701_v53 = vrot.slane %v2697_v31, 1  ;;  %v691_v49 = vrot.slane %v2702_v12, 1 }
 0x114   :  { %1315 = vrot.lane.b32.xlu0 %v1313_v8, %s3196_s15 }
 0x115   :  { %v2715_v55 = vpop.permute.xlu1 %719  ;;  %v692_v44 = vsel %vm169_vm3, %v2702_v12, %v691_v49  ;;  %v854_v49 = vstv %s2804_s7 }
 0x116   :  { %v710_v26 = vpop.permute.xlu0 %709  ;;  %v721_v42 = vrot.slane %v2715_v55, 1 }
 0x117   :  { %1345 = vrot.lane.b32.xlu1 %v1343_v43, %s3197_s13  ;;  %v711_v54 = vrot.slane %v710_v26, 1  ;;  %v632_v43 = vsel %vm107_vm1, %v2652_v9, %v631_v51 }
 0x118   :  { %1335 = vrot.lane.b32.xlu0 %v1333_v7, %s3197_s13  ;;  %v634_v62 = vadd.f32 %v632_v43, %v604_v47  ;;  %v722_v12 = vsel %vm200_vm4, %v2715_v55, %v721_v42  ;;  %v1467_v43 = vmul.f32 %v1466_v23, %v2704_v21 }
 0x119   :  { %v740_v34 = vpop.permute.xlu1 %739  ;;  %v712_v13 = vsel %vm200_vm4, %v710_v26, %v711_v54  ;;  %v674_v26 = vadd.f32 %v672_v46, %v644_v24 }
 0x11a   :  { %v730_v17 = vpop.permute.xlu0 %729  ;;  %v741_v28 = vrot.slane %v740_v34, 1  ;;  %v714_v37 = vadd.f32 %v712_v13, %v684_v19  ;;  %v850_v13 = vstv %s2796_s5 }
 0x11b   :  { %1379 = vrot.lane.b32.xlu1 %v1377_v39, %s3190_s0  ;;  %v731_v7 = vrot.slane %v730_v17, 1  ;;  %v702_v39 = vsel %vm169_vm3, %v2697_v31, %v701_v53  ;;  %v664_v31 = vadd.f32 %v662_v48, %v634_v62 }
 0x11c   :  { %1369 = vrot.lane.b32.xlu0 %v1367_v14, %s3190_s0  ;;  %v742_v14 = vsel %vm231_vm5, %v740_v34, %v741_v28  ;;  %v704_v38 = vadd.f32 %v702_v39, %v674_v26 }
 0x11d   :  { %v760_v8 = vpop.permute.xlu1 %759  ;;  %v732_v61 = vsel %vm200_vm4, %v730_v17, %v731_v7  ;;  %v744_v52 = vadd.f32 %v742_v14, %v714_v37  ;;  %v694_v20 = vadd.f32 %v692_v44, %v664_v31  ;;  %v1516_v44 = vstv %s2831_s6 }
 0x11e   :  { %v750_v57 = vpop.permute.xlu0 %749  ;;  %v734_v17 = vadd.f32 %v732_v61, %v704_v38  ;;  %v1506_v38 = vstv %s2835_s11 }
 0x11f   :  { %1399 = vrot.lane.b32.xlu1 %v1397_v29, %s3191_s19  ;;  %v761_v29 = vrot.slane %v760_v8, 1  ;;  %v724_v51 = vadd.f32 %v722_v12, %v694_v20 }
 0x120   :  { %1389 = vrot.lane.b32.xlu0 %v1387_v40, %s3190_s0  ;;  %s2799_s0 = sld [smem:[#allocation7]]  ;;  %v751_v40 = vrot.slane %v750_v57, 1 }
 0x121   :  { %v780_v25 = vpop.permute.xlu1 %779  ;;  %v762_v45 = vsel %vm231_vm5, %v760_v8, %v761_v29  ;;  %v842_v29 = vstv %s2824_s10 }
 0x122   :  { %v770_v33 = vpop.permute.xlu0 %769  ;;  %v781_v6 = vrot.slane %v780_v25, 1  ;;  %v752_v55 = vsel %vm231_vm5, %v750_v57, %v751_v40  ;;  %v764_v54 = vadd.f32 %v762_v45, %v734_v17  ;;  %v1507_v45 = vmul.f32 %v1506_v38, %v2704_v21 }
 0x123   :  { %v771_v4 = vrot.slane %v770_v33, 1  ;;  %1419 = vrot.lane.b32.xlu1 %v1417_v2, %s3191_s19  ;;  %v754_v53 = vadd.f32 %v752_v55, %v724_v51 }
 0x124   :  { %1409 = vrot.lane.b32.xlu0 %v2738_v18, %s3191_s19  ;;  %s2818_s19 = sld [smem:[#allocation7 + $0x1]]  ;;  %v782_v35 = vsel %vm262_vm6, %v780_v25, %v781_v6  ;;  %v1807_v25 = vld [vmem:[#allocation8 + $0x3] ss:$8 sm:$0x7] }
 0x125   :  { %v772_v2 = vsel %vm262_vm6, %v770_v33, %v771_v4  ;;  %v800_v34 = vpop.permute.xlu1 %799  ;;  %v784_v32 = vadd.f32 %v782_v35, %v754_v53  ;;  %v855_v62 = vmul.f32 %v1807_v25, %v854_v49  ;;  %v851_v14 = vmul.f32 %v1807_v25, %v850_v13 }
 0x126   :  { %v801_v18 = vrot.slane %v800_v34, 1  ;;  %v790_v16 = vpop.permute.xlu0 %789  ;;  %v774_v0 = vadd.f32 %v772_v2, %v744_v52  ;;  %v838_v15 = vstv %s2799_s0  ;;  %v1517_v2 = vmul.f32 %v1516_v44, %v2704_v21 }
 0x127   :  { %v791_v36 = vrot.slane %v790_v16, 1  ;;  %1439 = vrot.lane.b32.xlu1 %v2745_v58, %s3192_s18  ;;  %v856_v52 = vadd.f32 %v855_v62, %v842_v29  ;;  %v1596_v25 = vstv %s2892_s3  ;;  %v1586_v29 = vstv %s2896_s12 }
 0x128   :  { %v802_v10 = vsel %vm293_vm7, %v800_v34, %v801_v18  ;;  %1429 = vrot.lane.b32.xlu0 %v2748_v50, %s3192_s18  ;;  %v847_v50 = vmul.f32 %v846_v59, %v2259_v11  ;;  %v1496_v11 = vstv %s2810_s8  ;;  %v1536_v18 = vstv %s2849_s1 }
 0x129   :  { %v804_v1 = vadd.f32 %v802_v10, %v774_v0  ;;  %v792_v27 = vsel %vm262_vm6, %v790_v16, %v791_v36  ;;  %v820_v58 = vpop.permute.xlu1 %819  ;;  %v1497_v26 = vmul.f32 %v1496_v11, %v2704_v21  ;;  %v1526_v0 = vstv %s2854_s30 }
 0x12a   :  { %v821_v8 = vrot.slane %v820_v58, 1  ;;  %v810_v41 = vpop.permute.xlu0 %809  ;;  %v794_v28 = vadd.f32 %v792_v27, %v764_v54  ;;  %v848_v39 = vadd.f32 %v847_v50, %v838_v15  ;;  %v840_v37 = vstv %s2818_s19 }
 0x12b   :  { %829 = vst.msk [vmem:[#allocation9] ss:$8 sm:$0x7] %vm2785_vm8, %v804_v1  ;;  %v811_v57 = vrot.slane %v810_v41, 1  ;;  %1459 = vrot.lane.b32.xlu1 %v2762_v63, %s3193_s21  ;;  %v1486_v63 = vstv %s2815_s9  ;;  %v852_v34 = vadd.f32 %v851_v14, %v840_v37  ;;  %v1537_v23 = vmul.f32 %v1536_v18, %v2704_v21 }
 0x12c   :  { %v822_v46 = vsel %vm293_vm7, %v820_v58, %v821_v8  ;;  %1449 = vrot.lane.b32.xlu0 %v1447_v5, %s3192_s18  ;;  %v1487_v33 = vmul.f32 %v1486_v63, %v2704_v21  ;;  %s2866_s18 = sld [smem:[#allocation2 + $0x34]]  ;;  %v1527_v1 = vmul.f32 %v1526_v0, %v2704_v21  ;;  %v1587_v38 = vmul.f32 %v1586_v29, %v2704_v21 }
 0x12d   :  { %v824_v47 = vadd.f32 %v822_v46, %v794_v28  ;;  %v812_v24 = vsel %vm293_vm7, %v810_v41, %v811_v57  ;;  %v872_v7 = vpop.permute.xlu1 %871  ;;  %v1546_v41 = vstv %s2871_s14 }
 0x12e   :  { %v814_v48 = vadd.f32 %v812_v24, %v784_v32  ;;  %v862_v19 = vpop.permute.xlu0 %861  ;;  %v873_v40 = vrot.slane %v872_v7, 1  ;;  %v1547_v32 = vmul.f32 %v1546_v41, %v2704_v21  ;;  %v1566_v24 = vstv %s2884_s20 }
 0x12f   :  { %835 = vst.msk [vmem:[#allocation9 + $0x2] ss:$8 sm:$0x7] %vm2785_vm8, %v824_v47  ;;  %v863_v42 = vrot.slane %v862_v19, 1  ;;  %1479 = vrot.lane.b32.xlu1 %v1477_v56, %s3193_s21 }
 0x130   :  { %832 = vst.msk [vmem:[#allocation9 + $0x1] ss:$8 sm:$0x7] %vm2785_vm8, %v814_v48  ;;  %1469 = vrot.lane.b32.xlu0 %v1467_v43, %s3193_s21  ;;  %s2879_s21 = sld [smem:[#allocation2 + $0x1a]]  ;;  %v874_v16 = vsel %vm76_vm0, %v872_v7, %v873_v40 }
 0x131   :  { %v864_v4 = vsel %vm76_vm0, %v862_v19, %v863_v42  ;;  %v892_v31 = vpop.permute.xlu1 %891  ;;  %v876_v54 = vadd.f32 %v874_v16, %v852_v34  ;;  %v1567_v42 = vmul.f32 %v1566_v24, %v2704_v21 }
 0x132   :  { %v893_v61 = vrot.slane %v892_v31, 1  ;;  %v882_v5 = vpop.permute.xlu0 %881  ;;  %v866_v12 = vadd.f32 %v864_v4, %v848_v39  ;;  %v1556_v27 = vstv %s2866_s18  ;;  %v1597_v4 = vmul.f32 %v1596_v25, %v2704_v21 }
 0x133   :  { %v883_v6 = vrot.slane %v882_v5, 1  ;;  %1499 = vrot.lane.b32.xlu1 %v1497_v26, %s3194_s17  ;;  %v1557_v56 = vmul.f32 %v1556_v27, %v2704_v21 }
 0x134   :  { %v894_v20 = vsel %vm107_vm1, %v892_v31, %v893_v61  ;;  %1489 = vrot.lane.b32.xlu0 %v1487_v33, %s3194_s17 }
 0x135   :  { %v896_v59 = vadd.f32 %v894_v20, %v866_v12  ;;  %v884_v17 = vsel %vm76_vm0, %v882_v5, %v883_v6  ;;  %v912_v55 = vpop.permute.xlu1 %911 }
 0x136   :  { %v913_v36 = vrot.slane %v912_v55, 1  ;;  %v902_v51 = vpop.permute.xlu0 %901  ;;  %v886_v10 = vadd.f32 %v884_v17, %v856_v52  ;;  %v1576_v46 = vstv %s2879_s21 }
 0x137   :  { %v903_v60 = vrot.slane %v902_v51, 1  ;;  %1519 = vrot.lane.b32.xlu1 %v1517_v2, %s3195_s16  ;;  %v1577_v19 = vmul.f32 %v1576_v46, %v2704_v21 }
 0x138   :  { %v914_v35 = vsel %vm107_vm1, %v912_v55, %v913_v36  ;;  %1509 = vrot.lane.b32.xlu0 %v1507_v45, %s3194_s17  ;;  %s1888_s17 = smov [#allocation9]  }
 0x139   :  { %v916_v58 = vadd.f32 %v914_v35, %v886_v10  ;;  %v904_v53 = vsel %vm107_vm1, %v902_v51, %v903_v60  ;;  %v932_v8 = vpop.permute.xlu1 %931  ;;  %s1620_s22 = sshll.u32 %s1888_s17, 4  ;;  %s1621_s22 = int_to_ptr.vmem [resolvable:$true] %s1620_s22 }
 0x13a   :  { %v906_v15 = vadd.f32 %v904_v53, %v876_v54  ;;  %v933_v50 = vrot.slane %v932_v8, 1  ;;  %v922_v28 = vpop.permute.xlu0 %921  ;;  %s1849_s23 = scalar_lea.vmem %s1621_s22, 384  ;;  %p1854_p11 = scmp.lt.s32.totalorder %s1621_s22, %s1621_s22 }
 0x13b   :  { %v923_v57 = vrot.slane %v922_v28, 1  ;;  %1539 = vrot.lane.b32.xlu1 %v1537_v23, %s3195_s16  ;;  %p1850_p10 = scmp.ne.s32.totalorder %s1621_s22, %s1849_s23  ;;  %p1855_p12 = scmp.lt.s32.totalorder %s1849_s23, %s1849_s23 }
 0x13c   :  { %v934_v43 = vsel %vm138_vm2, %v932_v8, %v933_v50  ;;  %1529 = vrot.lane.b32.xlu0 %v1527_v1, %s3195_s16  ;;  %s2969_s16 = sld [smem:[#allocation2 + $0x3f]] }
 0x13d   :  { %v936_v49 = vadd.f32 %v934_v43, %v906_v15  ;;  %v924_v11 = vsel %vm138_vm2, %v922_v28, %v923_v57  ;;  %v952_v47 = vpop.permute.xlu1 %951  ;;  %p1856_p13 = por %p1855_p12, %p1854_p11 }
 0x13e   :  { %v926_v13 = vadd.f32 %v924_v11, %v896_v59  ;;  %v953_v7 = vrot.slane %v952_v47, 1  ;;  %v942_v63 = vpop.permute.xlu0 %941 }
 0x13f   :  { %v943_v48 = vrot.slane %v942_v63, 1  ;;  %1559 = vrot.lane.b32.xlu1 %v1557_v56, %s3196_s15  ;;  %p1857_p0 = pnand %p1856_p13, %p1850_p10 }
 0x140   :  { %v954_v39 = vsel %vm169_vm3, %v952_v47, %v953_v7  ;;  %1549 = vrot.lane.b32.xlu0 %v1547_v32, %s3196_s15 }
 0x141   :  { %v956_v62 = vadd.f32 %v954_v39, %v926_v13  ;;  %v944_v26 = vsel %vm138_vm2, %v942_v63, %v943_v48  ;;  %v972_v14 = vpop.permute.xlu1 %971 }
 0x142   :  { %v946_v33 = vadd.f32 %v944_v26, %v916_v58  ;;  %v973_v44 = vrot.slane %v972_v14, 1  ;;  %v962_v37 = vpop.permute.xlu0 %961 }
 0x143   :  { %v963_v40 = vrot.slane %v962_v37, 1  ;;  %1579 = vrot.lane.b32.xlu1 %v1577_v19, %s3197_s13 }
 0x144   :  { %v974_v31 = vsel %vm169_vm3, %v972_v14, %v973_v44  ;;  %1569 = vrot.lane.b32.xlu0 %v1567_v42, %s3196_s15  ;;  %s1742_s15 = sld [smem:[#allocation2 + $0x24]] }
 0x145   :  { %v976_v61 = vadd.f32 %v974_v31, %v946_v33  ;;  %v964_v5 = vsel %vm169_vm3, %v962_v37, %v963_v40  ;;  %v992_v12 = vpop.permute.xlu1 %991 }
 0x146   :  { %v966_v52 = vadd.f32 %v964_v5, %v936_v49  ;;  %v993_v6 = vrot.slane %v992_v12, 1  ;;  %v982_v2 = vpop.permute.xlu0 %981 }
 0x147   :  { %v983_v34 = vrot.slane %v982_v2, 1  ;;  %1599 = vrot.lane.b32.xlu1 %v1597_v4, %s3197_s13 }
 0x148   :  { %v994_v20 = vsel %vm200_vm4, %v992_v12, %v993_v6  ;;  %1589 = vrot.lane.b32.xlu0 %v1587_v38, %s3197_s13  ;;  %s1741_s13 = sld [smem:[#allocation2 + $0x9]] }
 0x149   :  { %v996_v45 = vadd.f32 %v994_v20, %v966_v52  ;;  %v984_v18 = vsel %vm200_vm4, %v982_v2, %v983_v34  ;;  %v1012_v16 = vpop.permute.xlu1 %1011 }
 0x14a   :  { %v986_v59 = vadd.f32 %v984_v18, %v956_v62  ;;  %v1013_v17 = vrot.slane %v1012_v16, 1  ;;  %v1002_v55 = vpop.permute.xlu0 %1001 }
 0x14b   :  { %v1003_v0 = vrot.slane %v1002_v55, 1 }
 0x14c   :  { %v1014_v36 = vsel %vm231_vm5, %v1012_v16, %v1013_v17  ;;  %v1104_v16 = vstv %s1742_s15 }
 0x14d   :  { %v1016_v51 = vadd.f32 %v1014_v36, %v986_v59  ;;  %v1004_v10 = vsel %vm200_vm4, %v1002_v55, %v1003_v0  ;;  %v1032_v60 = vpop.permute.xlu1 %1031 }
 0x14e   :  { %v1006_v23 = vadd.f32 %v1004_v10, %v976_v61  ;;  %v1033_v54 = vrot.slane %v1032_v60, 1  ;;  %v1022_v35 = vpop.permute.xlu0 %1021  ;;  %v1100_v2 = vstv %s1741_s13 }
 0x14f   :  { %v1023_v1 = vrot.slane %v1022_v35, 1 }
 0x150   :  { %v1034_v27 = vsel %vm231_vm5, %v1032_v60, %v1033_v54  ;;  %v1808_v60 = vld [vmem:[#allocation8 + $0x4] ss:$8 sm:$0x7] }
 0x151   :  { %v1036_v58 = vadd.f32 %v1034_v27, %v1006_v23  ;;  %v1024_v53 = vsel %vm231_vm5, %v1022_v35, %v1023_v1  ;;  %v1052_v8 = vpop.permute.xlu1 %1051  ;;  %v1105_v23 = vmul.f32 %v1808_v60, %v1104_v16  ;;  %v1101_v54 = vmul.f32 %v1808_v60, %v1100_v2 }
 0x152   :  { %v1026_v41 = vadd.f32 %v1024_v53, %v996_v45  ;;  %v1053_v15 = vrot.slane %v1052_v8, 1  ;;  %v1042_v50 = vpop.permute.xlu0 %1041  ;;  %v1108_v53 = vstv %s2969_s16 }
 0x153   :  { %v1043_v4 = vrot.slane %v1042_v50, 1 }
 0x154   :  { %v1054_v28 = vsel %vm262_vm6, %v1052_v8, %v1053_v15 }
 0x155   :  { %v1056_v57 = vadd.f32 %v1054_v28, %v1026_v41  ;;  %v1072_v56 = vpop.permute.xlu1 %1071  ;;  %v1044_v12 = vsel %vm262_vm6, %v1042_v50, %v1043_v4 }
 0x156   :  { %v1062_v43 = vpop.permute.xlu0 %1061  ;;  %v1073_v61 = vrot.slane %v1072_v56, 1  ;;  %v1046_v59 = vadd.f32 %v1044_v12, %v1016_v51 }
 0x157   :  { %v1063_v52 = vrot.slane %v1062_v43, 1 }
 0x158   :  { %v1074_v20 = vsel %vm293_vm7, %v1072_v56, %v1073_v61 }
 0x159   :  { %v1092_v32 = vpop.permute.xlu1 %1091  ;;  %v1064_v17 = vsel %vm262_vm6, %v1062_v43, %v1063_v52  ;;  %v1076_v36 = vadd.f32 %v1074_v20, %v1046_v59 }
 0x15a   :  { %v1082_v46 = vpop.permute.xlu0 %1081  ;;  %v1093_v45 = vrot.slane %v1092_v32, 1  ;;  %v1066_v8 = vadd.f32 %v1064_v17, %v1036_v58 }
 0x15b   :  { %v1083_v5 = vrot.slane %v1082_v46, 1  ;;  %v1102_v43 = vadd.f32 %v1101_v54, %v1076_v36 }
 0x15c   :  { %v1094_v1 = vsel %vm293_vm7, %v1092_v32, %v1093_v45 }
 0x15d   :  { %v1126_v49 = vpop.permute.xlu1 %1125  ;;  %v1084_v18 = vsel %vm293_vm7, %v1082_v46, %v1083_v5  ;;  %v1109_v46 = vmul.f32 %v1808_v60, %v1108_v53 }
 0x15e   :  { %v1116_v11 = vpop.permute.xlu0 %1115  ;;  %v1086_v10 = vadd.f32 %v1084_v18, %v1056_v57  ;;  %v1127_v27 = vrot.slane %v1126_v49, 1  ;;  %v1096_v57 = vadd.f32 %v1094_v1, %v1066_v8 }
 0x15f   :  { %v1117_v55 = vrot.slane %v1116_v11, 1 }
 0x160   :  { %v1106_v56 = vadd.f32 %v1105_v23, %v1086_v10  ;;  %v1128_v32 = vsel %vm76_vm0, %v1126_v49, %v1127_v27  ;;  %v1110_v16 = vadd.f32 %v1109_v46, %v1096_v57 }
 0x161   :  { %v2929_v47 = vpop.permute.xlu1 %1145  ;;  %v1118_v51 = vsel %vm76_vm0, %v1116_v11, %v1117_v55 }
 0x162   :  { %v2931_v24 = vpop.permute.xlu0 %1135  ;;  %v1147_v41 = vrot.slane %v2929_v47, 1  ;;  %v1120_v5 = vadd.f32 %v1118_v51, %v1102_v43  ;;  %v1130_v18 = vadd.f32 %v1128_v32, %v1106_v56 }
 0x163   :  { %v1137_v15 = vrot.slane %v2931_v24, 1 }
 0x164   :  { %v1148_v11 = vsel %vm107_vm1, %v2929_v47, %v1147_v41 }
 0x165   :  { %v2933_v13 = vpop.permute.xlu1 %1165  ;;  %v1138_v52 = vsel %vm76_vm0, %v2931_v24, %v1137_v15  ;;  %v1150_v17 = vadd.f32 %v1148_v11, %v1120_v5 }
 0x166   :  { %v2935_v7 = vpop.permute.xlu0 %1155  ;;  %v1167_v58 = vrot.slane %v2933_v13, 1 }
 0x167   :  { %v1157_v50 = vrot.slane %v2935_v7, 1 }
 0x168   :  { %v1168_v47 = vsel %vm107_vm1, %v2933_v13, %v1167_v58 }
 0x169   :  { %v2937_v63 = vpop.permute.xlu1 %1185  ;;  %v1158_v2 = vsel %vm107_vm1, %v2935_v7, %v1157_v50  ;;  %v1140_v7 = vadd.f32 %v1138_v52, %v1110_v16 }
 0x16a   :  { %v2939_v48 = vpop.permute.xlu0 %1175  ;;  %v1187_v12 = vrot.slane %v2937_v63, 1  ;;  %v1160_v36 = vadd.f32 %v1158_v2, %v1130_v18 }
 0x16b   :  { %v1177_v61 = vrot.slane %v2939_v48, 1  ;;  %v1170_v27 = vadd.f32 %v1168_v47, %v1140_v7 }
 0x16c   :  { %v1188_v10 = vsel %vm138_vm2, %v2937_v63, %v1187_v12 }
 0x16d   :  { %v2941_v19 = vpop.permute.xlu1 %1205  ;;  %v1178_v24 = vsel %vm138_vm2, %v2939_v48, %v1177_v61  ;;  %v1190_v51 = vadd.f32 %v1188_v10, %v1160_v36 }
 0x16e   :  { %v2943_v39 = vpop.permute.xlu0 %1195  ;;  %v1207_v20 = vrot.slane %v2941_v19, 1  ;;  %v1180_v53 = vadd.f32 %v1178_v24, %v1150_v17 }
 0x16f   :  { %v1197_v49 = vrot.slane %v2943_v39, 1 }
 0x170   :  { %v1208_v23 = vsel %vm169_vm3, %v2941_v19, %v1207_v20 }
 0x171   :  { %v2945_v42 = vpop.permute.xlu1 %1225  ;;  %v1198_v54 = vsel %vm138_vm2, %v2943_v39, %v1197_v49  ;;  %v1210_v15 = vadd.f32 %v1208_v23, %v1180_v53  ;;  %v1363_v53 = vmul.f32 %v2704_v21, %v582_v3 }
 0x172   :  { %v2947_v25 = vpop.permute.xlu0 %1215  ;;  %v1227_v55 = vrot.slane %v2945_v42, 1  ;;  %v1200_v50 = vadd.f32 %v1198_v54, %v1170_v27 }
 0x173   :  { %v1217_v13 = vrot.slane %v2947_v25, 1 }
 0x174   :  { %v1228_v19 = vsel %vm169_vm3, %v2945_v42, %v1227_v55 }
 0x175   :  { %v2949_v62 = vpop.permute.xlu1 %1245  ;;  %v1218_v43 = vsel %vm169_vm3, %v2947_v25, %v1217_v13  ;;  %v1230_v61 = vadd.f32 %v1228_v19, %v1200_v50 }
 0x176   :  { %v2951_v26 = vpop.permute.xlu0 %1235  ;;  %v1247_v8 = vrot.slane %v2949_v62, 1  ;;  %v1220_v20 = vadd.f32 %v1218_v43, %v1190_v51 }
 0x177   :  { %v1237_v60 = vrot.slane %v2951_v26, 1 }
 0x178   :  { %v1248_v5 = vsel %vm200_vm4, %v2949_v62, %v1247_v8  ;;  %v1359_v8 = vmul.f32 %v2704_v21, %v578_v22 }
 0x179   :  { %v2953_v14 = vpop.permute.xlu1 %1265  ;;  %v1238_v57 = vsel %vm200_vm4, %v2951_v26, %v1237_v60  ;;  %v1250_v47 = vadd.f32 %v1248_v5, %v1220_v20 }
 0x17a   :  { %v2955_v29 = vpop.permute.xlu0 %1255  ;;  %v1267_v63 = vrot.slane %v2953_v14, 1  ;;  %v1240_v25 = vadd.f32 %v1238_v57, %v1210_v15 }
 0x17b   :  { %v1257_v1 = vrot.slane %v2955_v29, 1 }
 0x17c   :  { %v1268_v26 = vsel %vm231_vm5, %v2953_v14, %v1267_v63 }
 0x17d   :  { %v2957_v33 = vpop.permute.xlu1 %1285  ;;  %v1258_v46 = vsel %vm200_vm4, %v2955_v29, %v1257_v1  ;;  %v1270_v18 = vadd.f32 %v1268_v26, %v1240_v25 }
 0x17e   :  { %v2959_v44 = vpop.permute.xlu0 %1275  ;;  %v1287_v39 = vrot.slane %v2957_v33, 1  ;;  %v1260_v49 = vadd.f32 %v1258_v46, %v1230_v61 }
 0x17f   :  { %v1277_v32 = vrot.slane %v2959_v44, 1 }
 0x180   :  { %v1288_v29 = vsel %vm231_vm5, %v2957_v33, %v1287_v39 }
 0x181   :  { %v2961_v37 = vpop.permute.xlu1 %1305  ;;  %v1278_v14 = vsel %vm231_vm5, %v2959_v44, %v1277_v32  ;;  %v1290_v24 = vadd.f32 %v1288_v29, %v1260_v49 }
 0x182   :  { %v2963_v40 = vpop.permute.xlu0 %1295  ;;  %v1307_v52 = vrot.slane %v2961_v37, 1 }
 0x183   :  { %v1297_v56 = vrot.slane %v2963_v40, 1 }
 0x185   :  { %v2965_v31 = vpop.permute.xlu1 %1325  ;;  %v1298_v62 = vsel %vm262_vm6, %v2963_v40, %v1297_v56  ;;  %v1308_v40 = vsel %vm262_vm6, %v2961_v37, %v1307_v52 }
 0x186   :  { %v2967_v38 = vpop.permute.xlu0 %1315  ;;  %v1327_v11 = vrot.slane %v2965_v31, 1  ;;  %v1300_v44 = vadd.f32 %v1298_v62, %v1270_v18 }
 0x187   :  { %v1317_v58 = vrot.slane %v2967_v38, 1 }
 0x188   :  { %v1328_v55 = vsel %vm293_vm7, %v2965_v31, %v1327_v11  ;;  %v1355_v31 = vmul.f32 %v2704_v21, %v574_v30 }
 0x189   :  { %v2972_v6 = vpop.permute.xlu1 %1345  ;;  %v1318_v16 = vsel %vm262_vm6, %v2967_v38, %v1317_v58  ;;  %v1280_v38 = vadd.f32 %v1278_v14, %v1250_v47  ;;  %v1330_v23 = vadd.f32 %v1328_v55, %v1300_v44 }
 0x18a   :  { %v2974_v34 = vpop.permute.xlu0 %1335  ;;  %v1347_v2 = vrot.slane %v2972_v6, 1  ;;  %v1320_v10 = vadd.f32 %v1318_v16, %v1290_v24 }
 0x18b   :  { %v1337_v17 = vrot.slane %v2974_v34, 1  ;;  %v1310_v1 = vadd.f32 %v1308_v40, %v1280_v38  ;;  %v1356_v39 = vadd.f32 %v1355_v31, %v1330_v23 }
 0x18c   :  { %v1348_v36 = vsel %vm293_vm7, %v2972_v6, %v1347_v2 }
 0x18d   :  { %v2979_v0 = vpop.permute.xlu1 %1379  ;;  %v1338_v54 = vsel %vm293_vm7, %v2974_v34, %v1337_v17  ;;  %v1350_v27 = vadd.f32 %v1348_v36, %v1320_v10 }
 0x18e   :  { %v2981_v35 = vpop.permute.xlu0 %1369  ;;  %v1340_v51 = vadd.f32 %v1338_v54, %v1310_v1  ;;  %v1381_v34 = vrot.slane %v2979_v0, 1 }
 0x18f   :  { %v1371_v60 = vrot.slane %v2981_v35, 1  ;;  %v1364_v57 = vadd.f32 %v1363_v53, %v1350_v27 }
 0x190   :  { %v1360_v32 = vadd.f32 %v1359_v8, %v1340_v51  ;;  %v1382_v58 = vsel %vm76_vm0, %v2979_v0, %v1381_v34 }
 0x191   :  { %v2989_v28 = vpop.permute.xlu1 %1399  ;;  %v1372_v30 = vsel %vm76_vm0, %v2981_v35, %v1371_v60 }
 0x192   :  { %v2991_v4 = vpop.permute.xlu0 %1389  ;;  %v1401_v37 = vrot.slane %v2989_v28, 1  ;;  %v1374_v56 = vadd.f32 %v1372_v30, %v1356_v39 }
 0x193   :  { %v1391_v63 = vrot.slane %v2991_v4, 1 }
 0x194   :  { %v1402_v3 = vsel %vm107_vm1, %v2989_v28, %v1401_v37 }
 0x195   :  { %v3005_v45 = vpop.permute.xlu1 %1419  ;;  %v1392_v43 = vsel %vm76_vm0, %v2991_v4, %v1391_v63  ;;  %v1404_v5 = vadd.f32 %v1402_v3, %v1374_v56 }
 0x196   :  { %v3007_v59 = vpop.permute.xlu0 %1409  ;;  %v1421_v15 = vrot.slane %v3005_v45, 1  ;;  %v1394_v29 = vadd.f32 %v1392_v43, %v1364_v57 }
 0x197   :  { %v1411_v46 = vrot.slane %v3007_v59, 1 }
 0x198   :  { %v1422_v26 = vsel %vm107_vm1, %v3005_v45, %v1421_v15  ;;  %v1384_v45 = vadd.f32 %v1382_v58, %v1360_v32 }
 0x199   :  { %v3023_v48 = vpop.permute.xlu1 %1439  ;;  %v1412_v0 = vsel %vm107_vm1, %v3007_v59, %v1411_v46  ;;  %v1424_v18 = vadd.f32 %v1422_v26, %v1394_v29 }
 0x19a   :  { %v3027_v41 = vpop.permute.xlu0 %1429  ;;  %v1441_v11 = vrot.slane %v3023_v48, 1  ;;  %v1414_v59 = vadd.f32 %v1412_v0, %v1384_v45 }
 0x19b   :  { %v1431_v19 = vrot.slane %v3027_v41, 1 }
 0x19c   :  { %v1442_v17 = vsel %vm138_vm2, %v3023_v48, %v1441_v11 }
 0x19d   :  { %v3041_v42 = vpop.permute.xlu1 %1459  ;;  %v1432_v61 = vsel %vm138_vm2, %v3027_v41, %v1431_v19  ;;  %v1444_v54 = vadd.f32 %v1442_v17, %v1414_v59 }
 0x19e   :  { %v3048_v12 = vpop.permute.xlu0 %1449  ;;  %v1461_v22 = vrot.slane %v3041_v42, 1  ;;  %v1434_v49 = vadd.f32 %v1432_v61, %v1404_v5 }
 0x19f   :  { %v1451_v35 = vrot.slane %v3048_v12, 1 }
 0x1a0   :  { %v1462_v52 = vsel %vm169_vm3, %v3041_v42, %v1461_v22 }
 0x1a1   :  { %v1480_v33 = vpop.permute.xlu1 %1479  ;;  %v1452_v41 = vsel %vm138_vm2, %v3048_v12, %v1451_v35  ;;  %v1464_v42 = vadd.f32 %v1462_v52, %v1434_v49 }
 0x1a2   :  { %v3063_v7 = vpop.permute.xlu0 %1469  ;;  %v1481_v25 = vrot.slane %v1480_v33, 1  ;;  %v1454_v40 = vadd.f32 %v1452_v41, %v1424_v18 }
 0x1a3   :  { %v1471_v62 = vrot.slane %v3063_v7, 1 }
 0x1a4   :  { %v1482_v47 = vsel %vm169_vm3, %v1480_v33, %v1481_v25 }
 0x1a5   :  { %v1500_v13 = vpop.permute.xlu1 %1499  ;;  %v1472_v38 = vsel %vm169_vm3, %v3063_v7, %v1471_v62  ;;  %v1484_v31 = vadd.f32 %v1482_v47, %v1454_v40 }
 0x1a6   :  { %v1490_v6 = vpop.permute.xlu0 %1489  ;;  %v1501_v24 = vrot.slane %v1500_v13, 1 }
 0x1a7   :  { %v1491_v28 = vrot.slane %v1490_v6, 1 }
 0x1a8   :  { %v1502_v33 = vsel %vm200_vm4, %v1500_v13, %v1501_v24 }
 0x1a9   :  { %v1520_v50 = vpop.permute.xlu1 %1519  ;;  %v1492_v14 = vsel %vm200_vm4, %v1490_v6, %v1491_v28  ;;  %v1474_v6 = vadd.f32 %v1472_v38, %v1444_v54 }
 0x1aa   :  { %v1510_v21 = vpop.permute.xlu0 %1509  ;;  %v1521_v2 = vrot.slane %v1520_v50, 1  ;;  %v1494_v10 = vadd.f32 %v1492_v14, %v1464_v42 }
 0x1ab   :  { %v1511_v16 = vrot.slane %v1510_v21, 1  ;;  %v1504_v39 = vadd.f32 %v1502_v33, %v1474_v6 }
 0x1ac   :  { %v1522_v44 = vsel %vm231_vm5, %v1520_v50, %v1521_v2 }
 0x1ad   :  { %v1540_v4 = vpop.permute.xlu1 %1539  ;;  %v1512_v48 = vsel %vm200_vm4, %v1510_v21, %v1511_v16  ;;  %v1524_v1 = vadd.f32 %v1522_v44, %v1494_v10 }
 0x1ae   :  { %v1530_v20 = vpop.permute.xlu0 %1529  ;;  %v1541_v12 = vrot.slane %v1540_v4, 1  ;;  %v1514_v7 = vadd.f32 %v1512_v48, %v1484_v31 }
 0x1af   :  { %v1531_v60 = vrot.slane %v1530_v20, 1 }
 0x1b0   :  { %v1542_v8 = vsel %vm231_vm5, %v1540_v4, %v1541_v12 }
 0x1b1   :  { %v1560_v55 = vpop.permute.xlu1 %1559  ;;  %v1532_v34 = vsel %vm231_vm5, %v1530_v20, %v1531_v60  ;;  %v1544_v50 = vadd.f32 %v1542_v8, %v1514_v7 }
 0x1b2   :  { %v1550_v36 = vpop.permute.xlu0 %1549  ;;  %v1561_v27 = vrot.slane %v1560_v55, 1  ;;  %v1534_v21 = vadd.f32 %v1532_v34, %v1504_v39 }
 0x1b3   :  { %v1551_v23 = vrot.slane %v1550_v36, 1 }
 0x1b4   :  { %v1562_v13 = vsel %vm262_vm6, %v1560_v55, %v1561_v27 }
 0x1b5   :  { %v1552_v37 = vsel %vm262_vm6, %v1550_v36, %v1551_v23  ;;  %v1580_v53 = vpop.permute.xlu1 %1579  ;;  %v1564_v32 = vadd.f32 %v1562_v13, %v1534_v21 }
 0x1b6   :  { %v1581_v63 = vrot.slane %v1580_v53, 1  ;;  %v1570_v51 = vpop.permute.xlu0 %1569  ;;  %v1554_v30 = vadd.f32 %v1552_v37, %v1524_v1 }
 0x1b7   :  { %v1571_v19 = vrot.slane %v1570_v51, 1 }
 0x1b8   :  { %v1582_v15 = vsel %vm293_vm7, %v1580_v53, %v1581_v63 }
 0x1b9   :  { %v1584_v3 = vadd.f32 %v1582_v15, %v1554_v30  ;;  %v1572_v57 = vsel %vm262_vm6, %v1570_v51, %v1571_v19  ;;  %v1600_v22 = vpop.permute.xlu1 %1599 }
 0x1ba   :  { %v1601_v56 = vrot.slane %v1600_v22, 1  ;;  %v1590_v43 = vpop.permute.xlu0 %1589  ;;  %v1574_v46 = vadd.f32 %v1572_v57, %v1544_v50 }
 0x1bb   :  { %1606 = vst.msk [vmem:[#allocation9 + $0x3] ss:$8 sm:$0x7] %vm2785_vm8, %v1584_v3  ;;  %v1591_v35 = vrot.slane %v1590_v43, 1 }
 0x1bc   :  { %v1602_v58 = vsel %vm293_vm7, %v1600_v22, %v1601_v56 }
 0x1bd   :  { %v1604_v61 = vadd.f32 %v1602_v58, %v1574_v46  ;;  %v1592_v28 = vsel %vm293_vm7, %v1590_v43, %v1591_v35 }
 0x1be   :  { %v1594_v5 = vadd.f32 %v1592_v28, %v1564_v32 }
 0x1bf   :  { %1612 = vst.msk [vmem:[#allocation9 + $0x5] ss:$8 sm:$0x7] %vm2785_vm8, %v1604_v61 }
 0x1c0   :  { %1609 = vst.msk [vmem:[#allocation9 + $0x4] ss:$8 sm:$0x7] %vm2785_vm8, %v1594_v5 }
 0x1c1   :  { %1860 = shalt.err (!%p1857_p0)
}
 0x1c2   :  { %s3218_s25 = sld [smem:[#allocation30_spill]] }
 0x1c8   :  { %1623 = dma.vmem_to_hbm [thread:$0]  %s1621_s22, 384, %s3218_s25, [#allocation4]  }
 0x1c9   :  { %1875 = dma.done.wait [#allocation4], 384  }
 0x1ca   :  { %1876 = vsyncadd [#allocation4], 4294966912 }
 0x1cb   :  { %1627 = vsyncpa [#allocation3], 1 }
 0x1cc   :  { %1628 = vsyncpa [#allocation4], 1 }
 0x1cd   :  { %1629 = vsyncpa [#allocation5], 1 }
 0x1ce   :  { %1630 = vsyncpa [#allocation6], 1 }

</bundles_post_ra>
